<compile_context>
chip_gen: v5e
topology: v5e:2x2
jax: 0.10.0
libtpu: 0.0.40
codegen_flags: <defaults>
</compile_context>

<pallas_src>
import jax
import jax.numpy as jnp
import numpy as np
from jax.experimental import pallas as pl
from jax.experimental.pallas import tpu as pltpu

# Shapes, shrunk from the original (window=114, dim=200, lstm_units=57, cls=200)
# but keeping the model's required invariant window // 2 == lstm_units.
B = 8                # batch (grown so the fused LSTM state fills 128 lanes)
DIM = 16             # conv input channels
U = 8                # lstm_units == conv out channels == hidden == seq len
WINDOW = 2 * U       # 16 -> AvgPool1d(2) output length == LSTM input size
F = WINDOW // 2      # LSTM input feature size (== U, model invariant)
CLS = 16             # nn.Linear(lstm_units, CLS) output size

BW = B * WINDOW      # 128 : conv-activation lane width
SW = 2 * B * U       # 128 : fused LSTM state width, lanes = dir*(B*U)+b*U+u
GW = 4 * SW          # 512 : fused gate width (i, f, g, o blocks of SW lanes)
KD = 3 * DIM + 8     # 56  : im2col rows (48 taps + ones-row for bias + zero pad)

# fin-slab row offsets (packed small constants, width 2*B = 16)
R_SEG = 0                  # (SW, 2B)  per-(dir,batch) unit-lane summing matrix
R_WC = SW                  # (CLS, 2U) [w_cls fwd | w_cls bwd(rev)] / (2U)
R_BC = SW + CLS            # (CLS, 1)  classifier bias
R_REV = SW + 2 * CLS       # (U, U)    time-reversal (antidiagonal) permutation
FIN_ROWS = R_REV + U       # 168


def _sigmoid(z):
    # One EUP op (tanh) + cheap VALU; avoids exp + divide on the serial chain.
    return 0.5 * (jnp.tanh(0.5 * z) + 1.0)


def cnn_lstm_kernel(xcol_ref, wcol_ref, w_in_ref, b_g_ref, w_rec_ref, fin_ref,
                    out_ref, hst_ref):
    f32 = jnp.float32

    # ---- Conv1d(DIM->U, k=3, pad=1) + Sigmoid: one im2col matmul (bias via
    #      the ones-row of xcol) ------------------------------------------------
    act = _sigmoid(jnp.dot(wcol_ref[...], xcol_ref[...],
                           preferred_element_type=f32))            # (U, BW)

    # ---- AvgPool1d(2) + both directions' LSTM input projections + gate bias:
    #      ONE matmul.  Pool matrix and per-direction w_ih are folded into w_in
    #      in the wrapper; the backward direction reads the time-reversed
    #      activations (rev = antidiagonal permutation), so row s of `gin`
    #      already holds fwd-time-s + bwd-time-(U-1-s) + bias and only a single
    #      row read remains inside the recurrence.
    #      Dropout(p=0.01) is inference-mode identity.
    rev = fin_ref[R_REV:R_REV + U, 0:U]                            # (U, U)
    act_rev = jnp.dot(rev, act, preferred_element_type=f32)        # (U, BW)
    act2 = jnp.concatenate([act, act_rev], axis=1)                 # (U, 2*BW)
    gin = jnp.dot(act2, w_in_ref[...],
                  preferred_element_type=f32) + b_g_ref[...]       # (U, GW)

    # ---- Fused bidirectional LSTM: U serial steps, 128-lane batched state ----
    # State lane layout: dir*(B*U) + b*U + u.  Each gate block is exactly one
    # 128-lane vreg, so the slices below are whole-vreg selects (no shuffles).
    # w_rec is loop-invariant; Mosaic keeps the pushed MXU RHS resident across
    # the unrolled steps.
    wrec = w_rec_ref[...]                                          # (SW, GW)
    hv = jnp.zeros((1, SW), f32)
    cv = jnp.zeros((1, SW), f32)
    for s in range(U):         # step s: forward time s, backward time U-1-s
        g = jnp.dot(hv, wrec, preferred_element_type=f32) + gin[s:s + 1, :]
        i_g = _sigmoid(g[:, 0 * SW:1 * SW])
        f_g = _sigmoid(g[:, 1 * SW:2 * SW])
        g_g = jnp.tanh(g[:, 2 * SW:3 * SW])
        o_g = _sigmoid(g[:, 3 * SW:4 * SW])
        cv = f_g * cv + i_g * g_g
        hv = o_g * jnp.tanh(cv)
        hst_ref[s:s + 1, :] = hv           # plain row store into VMEM scratch

    # ---- tanh -> mean over 2U features -> Linear -> Sigmoid ------------------
    th = jnp.tanh(hst_ref[...])                                    # (U, SW)
    zs = jnp.dot(th, fin_ref[R_SEG:R_SEG + SW, :],
                 preferred_element_type=f32)                       # (U, 2B)
    zs2 = jnp.concatenate([zs[:, 0:B], zs[:, B:2 * B]], axis=0)    # (2U, B)
    out_pre = (jnp.dot(fin_ref[R_WC:R_WC + CLS, 0:2 * U], zs2,
                       preferred_element_type=f32)
               + fin_ref[R_BC:R_BC + CLS, 0:1])                    # (CLS, B)
    out_ref[...] = _sigmoid(out_pre)


def cnn_lstm_forward(x, params):
    (conv_w, conv_b, w_ih_f, w_hh_f, b_ih_f, b_hh_f,
     w_ih_b, w_hh_b, b_ih_b, b_hh_b, w_cls, b_cls) = params
    f32 = jnp.float32
    assert x.shape == (B, DIM, WINDOW)
    assert WINDOW // 2 == U      # PyTorch model only runs under this invariant

    # ------------- layout / parameter packing (pure glue, no model compute) ---
    # im2col of the zero-padded conv input, a ones-row carrying the conv bias,
    # and zero rows padding the contraction dim to a multiple of 8:
    #   xcol[k*DIM+c, b*W+w] = xpad[b, c, w+k],  xcol[3*DIM, :] = 1
    xpad = jnp.pad(x, ((0, 0), (0, 0), (1, 1)))
    xsh = jnp.stack([xpad[:, :, k:k + WINDOW] for k in range(3)], axis=1)
    xcol = xsh.transpose(1, 2, 0, 3).reshape(3 * DIM, BW)
    xcol = jnp.concatenate(
        [xcol, jnp.ones((1, BW), f32), jnp.zeros((KD - 3 * DIM - 1, BW), f32)],
        axis=0)                                                          # (KD, BW)
    wcol = jnp.concatenate(
        [conv_w.transpose(0, 2, 1).reshape(U, 3 * DIM), conv_b.reshape(U, 1),
         jnp.zeros((U, KD - 3 * DIM - 1), f32)], axis=1)                 # (U, KD)

    # Fused (AvgPool1d(2) o input-projection) weight, both directions stacked
    # on the contraction axis.  Gate lane layout: gate*SW + dir*(B*U) + b*U + u.
    eye2 = jnp.eye(2, dtype=f32)
    eyeB = jnp.eye(B, dtype=f32)
    pool_one = 0.5 * jnp.repeat(jnp.eye(F, dtype=f32), 2, axis=0)        # (W, F)
    mf = jnp.einsum('wf,fgo->wgo', pool_one, w_ih_f.T.reshape(F, 4, U))  # (W,4,U)
    mb = jnp.einsum('wf,fgo->wgo', pool_one, w_ih_b.T.reshape(F, 4, U))
    tf_ = jnp.einsum('ab,wgo->awgbo', eyeB, mf)                          # (B,W,4,B,U)
    tb_ = jnp.einsum('ab,wgo->awgbo', eyeB, mb)
    w_in = jnp.concatenate(
        [jnp.stack([tf_, jnp.zeros_like(tf_)], axis=3).reshape(BW, GW),
         jnp.stack([jnp.zeros_like(tb_), tb_], axis=3).reshape(BW, GW)],
        axis=0)                                                          # (2BW, GW)

    bias_f = (b_ih_f + b_hh_f).reshape(4, U)
    bias_b = (b_ih_b + b_hh_b).reshape(4, U)
    b_g = jnp.broadcast_to(
        jnp.stack([bias_f, bias_b], axis=1)[:, :, None, :],
        (4, 2, B, U)).reshape(1, GW)

    # Block-diagonal (dir, batch) recurrent weight (SW, GW).
    whhT = jnp.stack([w_hh_f.T, w_hh_b.T], axis=0).reshape(2, U, 4, U)
    w_rec = jnp.einsum('de,bc,digo->dbigeco', eye2, eyeB, whhT).reshape(SW, GW)

    # Packed small-constant slab (width 2B): seg sums each (dir, batch) group
    # of U unit lanes; the classifier weight absorbs the 1/(2U) mean and the
    # backward direction's time reversal; rev is the antidiagonal permutation.
    seg = jnp.einsum('de,bc,u->dbuec', eye2, eyeB,
                     jnp.ones((U,), f32)).reshape(SW, 2 * B)
    wclsf = w_cls / (2.0 * U)
    wcat = jnp.concatenate([wclsf, wclsf[:, ::-1]], axis=1)              # (CLS, 2U)
    rev = jnp.eye(U, dtype=f32)[::-1]
    fin = jnp.zeros((FIN_ROWS, 2 * B), f32)
    fin = fin.at[R_SEG:R_SEG + SW, :].set(seg)
    fin = fin.at[R_WC:R_WC + CLS, 0:2 * U].set(wcat)
    fin = fin.at[R_BC:R_BC + CLS, 0:1].set(b_cls.reshape(CLS, 1))
    fin = fin.at[R_REV:R_REV + U, 0:U].set(rev)

    out_t = pl.pallas_call(
        cnn_lstm_kernel,
        out_shape=jax.ShapeDtypeStruct((CLS, B), jnp.float32),
        scratch_shapes=[pltpu.VMEM((U, SW), jnp.float32)],
    )(xcol, wcol, w_in, b_g, w_rec, fin)
    return out_t.T                                                       # (B, CLS)


def reference_forward(x, params):
    """Pure-JAX mirror of the PyTorch forward (eval mode)."""
    (conv_w, conv_b, w_ih_f, w_hh_f, b_ih_f, b_hh_f,
     w_ih_b, w_hh_b, b_ih_b, b_hh_b, w_cls, b_cls) = params
    xpad = jnp.pad(x, ((0, 0), (0, 0), (1, 1)))
    h = jnp.zeros((x.shape[0], U, WINDOW), jnp.float32) + conv_b[None, :, None]
    for k in range(3):
        h = h + jnp.einsum('uc,bct->but', conv_w[:, :, k],
                           xpad[:, :, k:k + WINDOW])
    h = jax.nn.sigmoid(h)
    seq = 0.5 * (h[:, :, 0::2] + h[:, :, 1::2])              # (B, T=U, F)

    def run_dir(order, w_ih, w_hh, b_ih, b_hh):
        hh = jnp.zeros((x.shape[0], U), jnp.float32)
        cc = jnp.zeros((x.shape[0], U), jnp.float32)
        outs = {}
        for t in order:
            g = seq[:, t, :] @ w_ih.T + b_ih + hh @ w_hh.T + b_hh
            i = jax.nn.sigmoid(g[:, 0:U])
            f = jax.nn.sigmoid(g[:, U:2 * U])
            gg = jnp.tanh(g[:, 2 * U:3 * U])
            o = jax.nn.sigmoid(g[:, 3 * U:4 * U])
            cc = f * cc + i * gg
            hh = o * jnp.tanh(cc)
            outs[t] = hh
        return jnp.stack([outs[t] for t in range(U)], axis=1)   # (B, T, U)

    out_f = run_dir(range(U), w_ih_f, w_hh_f, b_ih_f, b_hh_f)
    out_b = run_dir(range(U - 1, -1, -1), w_ih_b, w_hh_b, b_ih_b, b_hh_b)
    lstm_out = jnp.concatenate([out_f, out_b], axis=-1)         # (B, T, 2U)
    y = jnp.tanh(lstm_out).mean(axis=-1)                        # (B, U)
    y = y @ w_cls.T + b_cls
    return jax.nn.sigmoid(y)


def make_params(key):
    ks = jax.random.split(key, 14)
    u = lambda k, shape, bnd: jax.random.uniform(k, shape, jnp.float32, -bnd, bnd)
    bc_ = 1.0 / np.sqrt(DIM * 3)                                # conv fan_in
    bl_ = 1.0 / np.sqrt(U)                                      # lstm / linear
    conv_w = u(ks[0], (U, DIM, 3), bc_)
    conv_b = u(ks[1], (U,), bc_)
    w_ih_f = u(ks[2], (4 * U, F), bl_)
    w_hh_f = u(ks[3], (4 * U, U), bl_)
    b_ih_f = u(ks[4], (4 * U,), bl_)
    b_hh_f = u(ks[5], (4 * U,), bl_)
    w_ih_b = u(ks[6], (4 * U, F), bl_)
    w_hh_b = u(ks[7], (4 * U, U), bl_)
    b_ih_b = u(ks[8], (4 * U,), bl_)
    b_hh_b = u(ks[9], (4 * U,), bl_)
    w_cls = u(ks[10], (CLS, U), bl_)
    b_cls = u(ks[11], (CLS,), bl_)
    return (conv_w, conv_b, w_ih_f, w_hh_f, b_ih_f, b_hh_f,
            w_ih_b, w_hh_b, b_ih_b, b_hh_b, w_cls, b_cls)


if __name__ == "__main__":
    key = jax.random.PRNGKey(0)
    kx, kp = jax.random.split(key)
    x = jax.random.normal(kx, (B, DIM, WINDOW), jnp.float32)
    params = make_params(kp)

    out = jax.jit(cnn_lstm_forward)(x, params)
    out = jax.block_until_ready(out)

    ref = reference_forward(x, params)
    np.testing.assert_allclose(np.asarray(out), np.asarray(ref),
                               rtol=2e-4, atol=2e-5)
    print("KERNEL_OK")
</pallas_src>

<mosaic_0001>
module attributes {stable_mosaic.version = 11 : i64} {
  func.func @cnn_lstm_kernel(%arg0: memref<56x128xf32, #tpu.memory_space<vmem>>, %arg1: memref<8x56xf32, #tpu.memory_space<vmem>>, %arg2: memref<256x512xf32, #tpu.memory_space<vmem>>, %arg3: memref<1x512xf32, #tpu.memory_space<vmem>>, %arg4: memref<128x512xf32, #tpu.memory_space<vmem>>, %arg5: memref<168x16xf32, #tpu.memory_space<vmem>>, %arg6: memref<16x8xf32, #tpu.memory_space<vmem>>, %arg7: memref<8x128xf32, #tpu.memory_space<vmem>>) attributes {dimension_semantics = [], scalar_prefetch = 0 : i64, scratch_operands = 1 : i64, tpu.core_type = #tpu.core_type<tc>} {
    %c0 = arith.constant 0 : index
    %c0_0 = arith.constant 0 : index
    %0 = vector.load %arg1[%c0, %c0_0] : memref<8x56xf32, #tpu.memory_space<vmem>>, vector<8x56xf32>
    %c0_1 = arith.constant 0 : index
    %c0_2 = arith.constant 0 : index
    %1 = vector.load %arg0[%c0_1, %c0_2] : memref<56x128xf32, #tpu.memory_space<vmem>>, vector<56x128xf32>
    %cst = arith.constant dense<0.000000e+00> : vector<8x128xf32>
    %2 = tpu.matmul %0, %1, %cst {dimension_numbers = #tpu.dot_dimension_numbers<[1], [0], [0], [1], [0, 0, 1, 1], [], []>} : vector<8x56xf32>, vector<56x128xf32>, vector<8x128xf32> -> vector<8x128xf32>
    %cst_3 = arith.constant 5.000000e-01 : f32
    %3 = vector.broadcast %cst_3 : f32 to vector<8x128xf32>
    %4 = arith.mulf %3, %2 : vector<8x128xf32>
    %5 = math.tanh %4 : vector<8x128xf32>
    %cst_4 = arith.constant 1.000000e+00 : f32
    %6 = vector.broadcast %cst_4 : f32 to vector<8x128xf32>
    %7 = arith.addf %5, %6 : vector<8x128xf32>
    %cst_5 = arith.constant 5.000000e-01 : f32
    %8 = vector.broadcast %cst_5 : f32 to vector<8x128xf32>
    %9 = arith.mulf %8, %7 : vector<8x128xf32>
    %c160 = arith.constant 160 : index
    %c0_6 = arith.constant 0 : index
    %10 = vector.load %arg5[%c160, %c0_6] : memref<168x16xf32, #tpu.memory_space<vmem>>, vector<8x8xf32>
    %cst_7 = arith.constant dense<0.000000e+00> : vector<8x128xf32>
    %11 = tpu.matmul %10, %9, %cst_7 {dimension_numbers = #tpu.dot_dimension_numbers<[1], [0], [0], [1], [0, 0, 1, 1], [], []>} : vector<8x8xf32>, vector<8x128xf32>, vector<8x128xf32> -> vector<8x128xf32>
    %12 = tpu.concatenate %9, %11 in 1 : vector<8x128xf32>, vector<8x128xf32> -> vector<8x256xf32>
    %c0_8 = arith.constant 0 : index
    %c0_9 = arith.constant 0 : index
    %13 = vector.load %arg2[%c0_8, %c0_9] : memref<256x512xf32, #tpu.memory_space<vmem>>, vector<256x512xf32>
    %cst_10 = arith.constant dense<0.000000e+00> : vector<8x512xf32>
    %14 = tpu.matmul %12, %13, %cst_10 {dimension_numbers = #tpu.dot_dimension_numbers<[1], [0], [0], [1], [0, 0, 1, 1], [], []>} : vector<8x256xf32>, vector<256x512xf32>, vector<8x512xf32> -> vector<8x512xf32>
    %c0_11 = arith.constant 0 : index
    %c0_12 = arith.constant 0 : index
    %15 = vector.load %arg3[%c0_11, %c0_12] : memref<1x512xf32, #tpu.memory_space<vmem>>, vector<1x512xf32>
    %16 = vector.broadcast %15 : vector<1x512xf32> to vector<8x512xf32>
    %17 = arith.addf %14, %16 : vector<8x512xf32>
    %c0_13 = arith.constant 0 : index
    %c0_14 = arith.constant 0 : index
    %18 = vector.load %arg4[%c0_13, %c0_14] : memref<128x512xf32, #tpu.memory_space<vmem>>, vector<128x512xf32>
    %cst_15 = arith.constant 0.000000e+00 : f32
    %19 = vector.broadcast %cst_15 : f32 to vector<1x128xf32>
    %cst_16 = arith.constant 0.000000e+00 : f32
    %20 = vector.broadcast %cst_16 : f32 to vector<1x128xf32>
    %cst_17 = arith.constant dense<0.000000e+00> : vector<1x512xf32>
    %21 = tpu.matmul %19, %18, %cst_17 {dimension_numbers = #tpu.dot_dimension_numbers<[1], [0], [0], [1], [0, 0, 1, 1], [], []>} : vector<1x128xf32>, vector<128x512xf32>, vector<1x512xf32> -> vector<1x512xf32>
    %22 = vector.extract_strided_slice %17 {offsets = [0, 0], sizes = [1, 512], strides = [1, 1]} : vector<8x512xf32> to vector<1x512xf32>
    %23 = arith.addf %21, %22 : vector<1x512xf32>
    %24 = vector.extract_strided_slice %23 {offsets = [0, 0], sizes = [1, 128], strides = [1, 1]} : vector<1x512xf32> to vector<1x128xf32>
    %cst_18 = arith.constant 5.000000e-01 : f32
    %25 = vector.broadcast %cst_18 : f32 to vector<1x128xf32>
    %26 = arith.mulf %25, %24 : vector<1x128xf32>
    %27 = math.tanh %26 : vector<1x128xf32>
    %cst_19 = arith.constant 1.000000e+00 : f32
    %28 = vector.broadcast %cst_19 : f32 to vector<1x128xf32>
    %29 = arith.addf %27, %28 : vector<1x128xf32>
    %cst_20 = arith.constant 5.000000e-01 : f32
    %30 = vector.broadcast %cst_20 : f32 to vector<1x128xf32>
    %31 = arith.mulf %30, %29 : vector<1x128xf32>
    %32 = vector.extract_strided_slice %23 {offsets = [0, 128], sizes = [1, 128], strides = [1, 1]} : vector<1x512xf32> to vector<1x128xf32>
    %cst_21 = arith.constant 5.000000e-01 : f32
    %33 = vector.broadcast %cst_21 : f32 to vector<1x128xf32>
    %34 = arith.mulf %33, %32 : vector<1x128xf32>
    %35 = math.tanh %34 : vector<1x128xf32>
    %cst_22 = arith.constant 1.000000e+00 : f32
    %36 = vector.broadcast %cst_22 : f32 to vector<1x128xf32>
    %37 = arith.addf %35, %36 : vector<1x128xf32>
    %cst_23 = arith.constant 5.000000e-01 : f32
    %38 = vector.broadcast %cst_23 : f32 to vector<1x128xf32>
    %39 = arith.mulf %38, %37 : vector<1x128xf32>
    %40 = vector.extract_strided_slice %23 {offsets = [0, 256], sizes = [1, 128], strides = [1, 1]} : vector<1x512xf32> to vector<1x128xf32>
    %41 = math.tanh %40 : vector<1x128xf32>
    %42 = vector.extract_strided_slice %23 {offsets = [0, 384], sizes = [1, 128], strides = [1, 1]} : vector<1x512xf32> to vector<1x128xf32>
    %cst_24 = arith.constant 5.000000e-01 : f32
    %43 = vector.broadcast %cst_24 : f32 to vector<1x128xf32>
    %44 = arith.mulf %43, %42 : vector<1x128xf32>
    %45 = math.tanh %44 : vector<1x128xf32>
    %cst_25 = arith.constant 1.000000e+00 : f32
    %46 = vector.broadcast %cst_25 : f32 to vector<1x128xf32>
    %47 = arith.addf %45, %46 : vector<1x128xf32>
    %cst_26 = arith.constant 5.000000e-01 : f32
    %48 = vector.broadcast %cst_26 : f32 to vector<1x128xf32>
    %49 = arith.mulf %48, %47 : vector<1x128xf32>
    %50 = arith.mulf %39, %20 : vector<1x128xf32>
    %51 = arith.mulf %31, %41 : vector<1x128xf32>
    %52 = arith.addf %50, %51 : vector<1x128xf32>
    %53 = math.tanh %52 : vector<1x128xf32>
    %54 = arith.mulf %49, %53 : vector<1x128xf32>
    %c0_27 = arith.constant 0 : index
    %c0_28 = arith.constant 0 : index
    %55 = vector.load %arg7[%c0_27, %c0_28] : memref<8x128xf32, #tpu.memory_space<vmem>>, vector<1x128xf32>
    tpu.vector_store %arg7[%c0_27, %c0_28], %54 {strides = array<i32>} : memref<8x128xf32, #tpu.memory_space<vmem>>, vector<1x128xf32>,
    %cst_29 = arith.constant dense<0.000000e+00> : vector<1x512xf32>
    %56 = tpu.matmul %54, %18, %cst_29 {dimension_numbers = #tpu.dot_dimension_numbers<[1], [0], [0], [1], [0, 0, 1, 1], [], []>} : vector<1x128xf32>, vector<128x512xf32>, vector<1x512xf32> -> vector<1x512xf32>
    %57 = vector.extract_strided_slice %17 {offsets = [1, 0], sizes = [1, 512], strides = [1, 1]} : vector<8x512xf32> to vector<1x512xf32>
    %58 = arith.addf %56, %57 : vector<1x512xf32>
    %59 = vector.extract_strided_slice %58 {offsets = [0, 0], sizes = [1, 128], strides = [1, 1]} : vector<1x512xf32> to vector<1x128xf32>
    %cst_30 = arith.constant 5.000000e-01 : f32
    %60 = vector.broadcast %cst_30 : f32 to vector<1x128xf32>
    %61 = arith.mulf %60, %59 : vector<1x128xf32>
    %62 = math.tanh %61 : vector<1x128xf32>
    %cst_31 = arith.constant 1.000000e+00 : f32
    %63 = vector.broadcast %cst_31 : f32 to vector<1x128xf32>
    %64 = arith.addf %62, %63 : vector<1x128xf32>
    %cst_32 = arith.constant 5.000000e-01 : f32
    %65 = vector.broadcast %cst_32 : f32 to vector<1x128xf32>
    %66 = arith.mulf %65, %64 : vector<1x128xf32>
    %67 = vector.extract_strided_slice %58 {offsets = [0, 128], sizes = [1, 128], strides = [1, 1]} : vector<1x512xf32> to vector<1x128xf32>
    %cst_33 = arith.constant 5.000000e-01 : f32
    %68 = vector.broadcast %cst_33 : f32 to vector<1x128xf32>
    %69 = arith.mulf %68, %67 : vector<1x128xf32>
    %70 = math.tanh %69 : vector<1x128xf32>
    %cst_34 = arith.constant 1.000000e+00 : f32
    %71 = vector.broadcast %cst_34 : f32 to vector<1x128xf32>
    %72 = arith.addf %70, %71 : vector<1x128xf32>
    %cst_35 = arith.constant 5.000000e-01 : f32
    %73 = vector.broadcast %cst_35 : f32 to vector<1x128xf32>
    %74 = arith.mulf %73, %72 : vector<1x128xf32>
    %75 = vector.extract_strided_slice %58 {offsets = [0, 256], sizes = [1, 128], strides = [1, 1]} : vector<1x512xf32> to vector<1x128xf32>
    %76 = math.tanh %75 : vector<1x128xf32>
    %77 = vector.extract_strided_slice %58 {offsets = [0, 384], sizes = [1, 128], strides = [1, 1]} : vector<1x512xf32> to vector<1x128xf32>
    %cst_36 = arith.constant 5.000000e-01 : f32
    %78 = vector.broadcast %cst_36 : f32 to vector<1x128xf32>
    %79 = arith.mulf %78, %77 : vector<1x128xf32>
    %80 = math.tanh %79 : vector<1x128xf32>
    %cst_37 = arith.constant 1.000000e+00 : f32
    %81 = vector.broadcast %cst_37 : f32 to vector<1x128xf32>
    %82 = arith.addf %80, %81 : vector<1x128xf32>
    %cst_38 = arith.constant 5.000000e-01 : f32
    %83 = vector.broadcast %cst_38 : f32 to vector<1x128xf32>
    %84 = arith.mulf %83, %82 : vector<1x128xf32>
    %85 = arith.mulf %74, %52 : vector<1x128xf32>
    %86 = arith.mulf %66, %76 : vector<1x128xf32>
    %87 = arith.addf %85, %86 : vector<1x128xf32>
    %88 = math.tanh %87 : vector<1x128xf32>
    %89 = arith.mulf %84, %88 : vector<1x128xf32>
    %c1 = arith.constant 1 : index
    %c0_39 = arith.constant 0 : index
    %90 = vector.load %arg7[%c1, %c0_39] : memref<8x128xf32, #tpu.memory_space<vmem>>, vector<1x128xf32>
    tpu.vector_store %arg7[%c1, %c0_39], %89 {strides = array<i32>} : memref<8x128xf32, #tpu.memory_space<vmem>>, vector<1x128xf32>,
    %cst_40 = arith.constant dense<0.000000e+00> : vector<1x512xf32>
    %91 = tpu.matmul %89, %18, %cst_40 {dimension_numbers = #tpu.dot_dimension_numbers<[1], [0], [0], [1], [0, 0, 1, 1], [], []>} : vector<1x128xf32>, vector<128x512xf32>, vector<1x512xf32> -> vector<1x512xf32>
    %92 = vector.extract_strided_slice %17 {offsets = [2, 0], sizes = [1, 512], strides = [1, 1]} : vector<8x512xf32> to vector<1x512xf32>
    %93 = arith.addf %91, %92 : vector<1x512xf32>
    %94 = vector.extract_strided_slice %93 {offsets = [0, 0], sizes = [1, 128], strides = [1, 1]} : vector<1x512xf32> to vector<1x128xf32>
    %cst_41 = arith.constant 5.000000e-01 : f32
    %95 = vector.broadcast %cst_41 : f32 to vector<1x128xf32>
    %96 = arith.mulf %95, %94 : vector<1x128xf32>
    %97 = math.tanh %96 : vector<1x128xf32>
    %cst_42 = arith.constant 1.000000e+00 : f32
    %98 = vector.broadcast %cst_42 : f32 to vector<1x128xf32>
    %99 = arith.addf %97, %98 : vector<1x128xf32>
    %cst_43 = arith.constant 5.000000e-01 : f32
    %100 = vector.broadcast %cst_43 : f32 to vector<1x128xf32>
    %101 = arith.mulf %100, %99 : vector<1x128xf32>
    %102 = vector.extract_strided_slice %93 {offsets = [0, 128], sizes = [1, 128], strides = [1, 1]} : vector<1x512xf32> to vector<1x128xf32>
    %cst_44 = arith.constant 5.000000e-01 : f32
    %103 = vector.broadcast %cst_44 : f32 to vector<1x128xf32>
    %104 = arith.mulf %103, %102 : vector<1x128xf32>
    %105 = math.tanh %104 : vector<1x128xf32>
    %cst_45 = arith.constant 1.000000e+00 : f32
    %106 = vector.broadcast %cst_45 : f32 to vector<1x128xf32>
    %107 = arith.addf %105, %106 : vector<1x128xf32>
    %cst_46 = arith.constant 5.000000e-01 : f32
    %108 = vector.broadcast %cst_46 : f32 to vector<1x128xf32>
    %109 = arith.mulf %108, %107 : vector<1x128xf32>
    %110 = vector.extract_strided_slice %93 {offsets = [0, 256], sizes = [1, 128], strides = [1, 1]} : vector<1x512xf32> to vector<1x128xf32>
    %111 = math.tanh %110 : vector<1x128xf32>
    %112 = vector.extract_strided_slice %93 {offsets = [0, 384], sizes = [1, 128], strides = [1, 1]} : vector<1x512xf32> to vector<1x128xf32>
    %cst_47 = arith.constant 5.000000e-01 : f32
    %113 = vector.broadcast %cst_47 : f32 to vector<1x128xf32>
    %114 = arith.mulf %113, %112 : vector<1x128xf32>
    %115 = math.tanh %114 : vector<1x128xf32>
    %cst_48 = arith.constant 1.000000e+00 : f32
    %116 = vector.broadcast %cst_48 : f32 to vector<1x128xf32>
    %117 = arith.addf %115, %116 : vector<1x128xf32>
    %cst_49 = arith.constant 5.000000e-01 : f32
    %118 = vector.broadcast %cst_49 : f32 to vector<1x128xf32>
    %119 = arith.mulf %118, %117 : vector<1x128xf32>
    %120 = arith.mulf %109, %87 : vector<1x128xf32>
    %121 = arith.mulf %101, %111 : vector<1x128xf32>
    %122 = arith.addf %120, %121 : vector<1x128xf32>
    %123 = math.tanh %122 : vector<1x128xf32>
    %124 = arith.mulf %119, %123 : vector<1x128xf32>
    %c2 = arith.constant 2 : index
    %c0_50 = arith.constant 0 : index
    %125 = vector.load %arg7[%c2, %c0_50] : memref<8x128xf32, #tpu.memory_space<vmem>>, vector<1x128xf32>
    tpu.vector_store %arg7[%c2, %c0_50], %124 {strides = array<i32>} : memref<8x128xf32, #tpu.memory_space<vmem>>, vector<1x128xf32>,
    %cst_51 = arith.constant dense<0.000000e+00> : vector<1x512xf32>
    %126 = tpu.matmul %124, %18, %cst_51 {dimension_numbers = #tpu.dot_dimension_numbers<[1], [0], [0], [1], [0, 0, 1, 1], [], []>} : vector<1x128xf32>, vector<128x512xf32>, vector<1x512xf32> -> vector<1x512xf32>
    %127 = vector.extract_strided_slice %17 {offsets = [3, 0], sizes = [1, 512], strides = [1, 1]} : vector<8x512xf32> to vector<1x512xf32>
    %128 = arith.addf %126, %127 : vector<1x512xf32>
    %129 = vector.extract_strided_slice %128 {offsets = [0, 0], sizes = [1, 128], strides = [1, 1]} : vector<1x512xf32> to vector<1x128xf32>
    %cst_52 = arith.constant 5.000000e-01 : f32
    %130 = vector.broadcast %cst_52 : f32 to vector<1x128xf32>
    %131 = arith.mulf %130, %129 : vector<1x128xf32>
    %132 = math.tanh %131 : vector<1x128xf32>
    %cst_53 = arith.constant 1.000000e+00 : f32
    %133 = vector.broadcast %cst_53 : f32 to vector<1x128xf32>
    %134 = arith.addf %132, %133 : vector<1x128xf32>
    %cst_54 = arith.constant 5.000000e-01 : f32
    %135 = vector.broadcast %cst_54 : f32 to vector<1x128xf32>
    %136 = arith.mulf %135, %134 : vector<1x128xf32>
    %137 = vector.extract_strided_slice %128 {offsets = [0, 128], sizes = [1, 128], strides = [1, 1]} : vector<1x512xf32> to vector<1x128xf32>
    %cst_55 = arith.constant 5.000000e-01 : f32
    %138 = vector.broadcast %cst_55 : f32 to vector<1x128xf32>
    %139 = arith.mulf %138, %137 : vector<1x128xf32>
    %140 = math.tanh %139 : vector<1x128xf32>
    %cst_56 = arith.constant 1.000000e+00 : f32
    %141 = vector.broadcast %cst_56 : f32 to vector<1x128xf32>
    %142 = arith.addf %140, %141 : vector<1x128xf32>
    %cst_57 = arith.constant 5.000000e-01 : f32
    %143 = vector.broadcast %cst_57 : f32 to vector<1x128xf32>
    %144 = arith.mulf %143, %142 : vector<1x128xf32>
    %145 = vector.extract_strided_slice %128 {offsets = [0, 256], sizes = [1, 128], strides = [1, 1]} : vector<1x512xf32> to vector<1x128xf32>
    %146 = math.tanh %145 : vector<1x128xf32>
    %147 = vector.extract_strided_slice %128 {offsets = [0, 384], sizes = [1, 128], strides = [1, 1]} : vector<1x512xf32> to vector<1x128xf32>
    %cst_58 = arith.constant 5.000000e-01 : f32
    %148 = vector.broadcast %cst_58 : f32 to vector<1x128xf32>
    %149 = arith.mulf %148, %147 : vector<1x128xf32>
    %150 = math.tanh %149 : vector<1x128xf32>
    %cst_59 = arith.constant 1.000000e+00 : f32
    %151 = vector.broadcast %cst_59 : f32 to vector<1x128xf32>
    %152 = arith.addf %150, %151 : vector<1x128xf32>
    %cst_60 = arith.constant 5.000000e-01 : f32
    %153 = vector.broadcast %cst_60 : f32 to vector<1x128xf32>
    %154 = arith.mulf %153, %152 : vector<1x128xf32>
    %155 = arith.mulf %144, %122 : vector<1x128xf32>
    %156 = arith.mulf %136, %146 : vector<1x128xf32>
    %157 = arith.addf %155, %156 : vector<1x128xf32>
    %158 = math.tanh %157 : vector<1x128xf32>
    %159 = arith.mulf %154, %158 : vector<1x128xf32>
    %c3 = arith.constant 3 : index
    %c0_61 = arith.constant 0 : index
    %160 = vector.load %arg7[%c3, %c0_61] : memref<8x128xf32, #tpu.memory_space<vmem>>, vector<1x128xf32>
    tpu.vector_store %arg7[%c3, %c0_61], %159 {strides = array<i32>} : memref<8x128xf32, #tpu.memory_space<vmem>>, vector<1x128xf32>,
    %cst_62 = arith.constant dense<0.000000e+00> : vector<1x512xf32>
    %161 = tpu.matmul %159, %18, %cst_62 {dimension_numbers = #tpu.dot_dimension_numbers<[1], [0], [0], [1], [0, 0, 1, 1], [], []>} : vector<1x128xf32>, vector<128x512xf32>, vector<1x512xf32> -> vector<1x512xf32>
    %162 = vector.extract_strided_slice %17 {offsets = [4, 0], sizes = [1, 512], strides = [1, 1]} : vector<8x512xf32> to vector<1x512xf32>
    %163 = arith.addf %161, %162 : vector<1x512xf32>
    %164 = vector.extract_strided_slice %163 {offsets = [0, 0], sizes = [1, 128], strides = [1, 1]} : vector<1x512xf32> to vector<1x128xf32>
    %cst_63 = arith.constant 5.000000e-01 : f32
    %165 = vector.broadcast %cst_63 : f32 to vector<1x128xf32>
    %166 = arith.mulf %165, %164 : vector<1x128xf32>
    %167 = math.tanh %166 : vector<1x128xf32>
    %cst_64 = arith.constant 1.000000e+00 : f32
    %168 = vector.broadcast %cst_64 : f32 to vector<1x128xf32>
    %169 = arith.addf %167, %168 : vector<1x128xf32>
    %cst_65 = arith.constant 5.000000e-01 : f32
    %170 = vector.broadcast %cst_65 : f32 to vector<1x128xf32>
    %171 = arith.mulf %170, %169 : vector<1x128xf32>
    %172 = vector.extract_strided_slice %163 {offsets = [0, 128], sizes = [1, 128], strides = [1, 1]} : vector<1x512xf32> to vector<1x128xf32>
    %cst_66 = arith.constant 5.000000e-01 : f32
    %173 = vector.broadcast %cst_66 : f32 to vector<1x128xf32>
    %174 = arith.mulf %173, %172 : vector<1x128xf32>
    %175 = math.tanh %174 : vector<1x128xf32>
    %cst_67 = arith.constant 1.000000e+00 : f32
    %176 = vector.broadcast %cst_67 : f32 to vector<1x128xf32>
    %177 = arith.addf %175, %176 : vector<1x128xf32>
    %cst_68 = arith.constant 5.000000e-01 : f32
    %178 = vector.broadcast %cst_68 : f32 to vector<1x128xf32>
    %179 = arith.mulf %178, %177 : vector<1x128xf32>
    %180 = vector.extract_strided_slice %163 {offsets = [0, 256], sizes = [1, 128], strides = [1, 1]} : vector<1x512xf32> to vector<1x128xf32>
    %181 = math.tanh %180 : vector<1x128xf32>
    %182 = vector.extract_strided_slice %163 {offsets = [0, 384], sizes = [1, 128], strides = [1, 1]} : vector<1x512xf32> to vector<1x128xf32>
    %cst_69 = arith.constant 5.000000e-01 : f32
    %183 = vector.broadcast %cst_69 : f32 to vector<1x128xf32>
    %184 = arith.mulf %183, %182 : vector<1x128xf32>
    %185 = math.tanh %184 : vector<1x128xf32>
    %cst_70 = arith.constant 1.000000e+00 : f32
    %186 = vector.broadcast %cst_70 : f32 to vector<1x128xf32>
    %187 = arith.addf %185, %186 : vector<1x128xf32>
    %cst_71 = arith.constant 5.000000e-01 : f32
    %188 = vector.broadcast %cst_71 : f32 to vector<1x128xf32>
    %189 = arith.mulf %188, %187 : vector<1x128xf32>
    %190 = arith.mulf %179, %157 : vector<1x128xf32>
    %191 = arith.mulf %171, %181 : vector<1x128xf32>
    %192 = arith.addf %190, %191 : vector<1x128xf32>
    %193 = math.tanh %192 : vector<1x128xf32>
    %194 = arith.mulf %189, %193 : vector<1x128xf32>
    %c4 = arith.constant 4 : index
    %c0_72 = arith.constant 0 : index
    %195 = vector.load %arg7[%c4, %c0_72] : memref<8x128xf32, #tpu.memory_space<vmem>>, vector<1x128xf32>
    tpu.vector_store %arg7[%c4, %c0_72], %194 {strides = array<i32>} : memref<8x128xf32, #tpu.memory_space<vmem>>, vector<1x128xf32>,
    %cst_73 = arith.constant dense<0.000000e+00> : vector<1x512xf32>
    %196 = tpu.matmul %194, %18, %cst_73 {dimension_numbers = #tpu.dot_dimension_numbers<[1], [0], [0], [1], [0, 0, 1, 1], [], []>} : vector<1x128xf32>, vector<128x512xf32>, vector<1x512xf32> -> vector<1x512xf32>
    %197 = vector.extract_strided_slice %17 {offsets = [5, 0], sizes = [1, 512], strides = [1, 1]} : vector<8x512xf32> to vector<1x512xf32>
    %198 = arith.addf %196, %197 : vector<1x512xf32>
    %199 = vector.extract_strided_slice %198 {offsets = [0, 0], sizes = [1, 128], strides = [1, 1]} : vector<1x512xf32> to vector<1x128xf32>
    %cst_74 = arith.constant 5.000000e-01 : f32
    %200 = vector.broadcast %cst_74 : f32 to vector<1x128xf32>
    %201 = arith.mulf %200, %199 : vector<1x128xf32>
    %202 = math.tanh %201 : vector<1x128xf32>
    %cst_75 = arith.constant 1.000000e+00 : f32
    %203 = vector.broadcast %cst_75 : f32 to vector<1x128xf32>
    %204 = arith.addf %202, %203 : vector<1x128xf32>
    %cst_76 = arith.constant 5.000000e-01 : f32
    %205 = vector.broadcast %cst_76 : f32 to vector<1x128xf32>
    %206 = arith.mulf %205, %204 : vector<1x128xf32>
    %207 = vector.extract_strided_slice %198 {offsets = [0, 128], sizes = [1, 128], strides = [1, 1]} : vector<1x512xf32> to vector<1x128xf32>
    %cst_77 = arith.constant 5.000000e-01 : f32
    %208 = vector.broadcast %cst_77 : f32 to vector<1x128xf32>
    %209 = arith.mulf %208, %207 : vector<1x128xf32>
    %210 = math.tanh %209 : vector<1x128xf32>
    %cst_78 = arith.constant 1.000000e+00 : f32
    %211 = vector.broadcast %cst_78 : f32 to vector<1x128xf32>
    %212 = arith.addf %210, %211 : vector<1x128xf32>
    %cst_79 = arith.constant 5.000000e-01 : f32
    %213 = vector.broadcast %cst_79 : f32 to vector<1x128xf32>
    %214 = arith.mulf %213, %212 : vector<1x128xf32>
    %215 = vector.extract_strided_slice %198 {offsets = [0, 256], sizes = [1, 128], strides = [1, 1]} : vector<1x512xf32> to vector<1x128xf32>
    %216 = math.tanh %215 : vector<1x128xf32>
    %217 = vector.extract_strided_slice %198 {offsets = [0, 384], sizes = [1, 128], strides = [1, 1]} : vector<1x512xf32> to vector<1x128xf32>
    %cst_80 = arith.constant 5.000000e-01 : f32
    %218 = vector.broadcast %cst_80 : f32 to vector<1x128xf32>
    %219 = arith.mulf %218, %217 : vector<1x128xf32>
    %220 = math.tanh %219 : vector<1x128xf32>
    %cst_81 = arith.constant 1.000000e+00 : f32
    %221 = vector.broadcast %cst_81 : f32 to vector<1x128xf32>
    %222 = arith.addf %220, %221 : vector<1x128xf32>
    %cst_82 = arith.constant 5.000000e-01 : f32
    %223 = vector.broadcast %cst_82 : f32 to vector<1x128xf32>
    %224 = arith.mulf %223, %222 : vector<1x128xf32>
    %225 = arith.mulf %214, %192 : vector<1x128xf32>
    %226 = arith.mulf %206, %216 : vector<1x128xf32>
    %227 = arith.addf %225, %226 : vector<1x128xf32>
    %228 = math.tanh %227 : vector<1x128xf32>
    %229 = arith.mulf %224, %228 : vector<1x128xf32>
    %c5 = arith.constant 5 : index
    %c0_83 = arith.constant 0 : index
    %230 = vector.load %arg7[%c5, %c0_83] : memref<8x128xf32, #tpu.memory_space<vmem>>, vector<1x128xf32>
    tpu.vector_store %arg7[%c5, %c0_83], %229 {strides = array<i32>} : memref<8x128xf32, #tpu.memory_space<vmem>>, vector<1x128xf32>,
    %cst_84 = arith.constant dense<0.000000e+00> : vector<1x512xf32>
    %231 = tpu.matmul %229, %18, %cst_84 {dimension_numbers = #tpu.dot_dimension_numbers<[1], [0], [0], [1], [0, 0, 1, 1], [], []>} : vector<1x128xf32>, vector<128x512xf32>, vector<1x512xf32> -> vector<1x512xf32>
    %232 = vector.extract_strided_slice %17 {offsets = [6, 0], sizes = [1, 512], strides = [1, 1]} : vector<8x512xf32> to vector<1x512xf32>
    %233 = arith.addf %231, %232 : vector<1x512xf32>
    %234 = vector.extract_strided_slice %233 {offsets = [0, 0], sizes = [1, 128], strides = [1, 1]} : vector<1x512xf32> to vector<1x128xf32>
    %cst_85 = arith.constant 5.000000e-01 : f32
    %235 = vector.broadcast %cst_85 : f32 to vector<1x128xf32>
    %236 = arith.mulf %235, %234 : vector<1x128xf32>
    %237 = math.tanh %236 : vector<1x128xf32>
    %cst_86 = arith.constant 1.000000e+00 : f32
    %238 = vector.broadcast %cst_86 : f32 to vector<1x128xf32>
    %239 = arith.addf %237, %238 : vector<1x128xf32>
    %cst_87 = arith.constant 5.000000e-01 : f32
    %240 = vector.broadcast %cst_87 : f32 to vector<1x128xf32>
    %241 = arith.mulf %240, %239 : vector<1x128xf32>
    %242 = vector.extract_strided_slice %233 {offsets = [0, 128], sizes = [1, 128], strides = [1, 1]} : vector<1x512xf32> to vector<1x128xf32>
    %cst_88 = arith.constant 5.000000e-01 : f32
    %243 = vector.broadcast %cst_88 : f32 to vector<1x128xf32>
    %244 = arith.mulf %243, %242 : vector<1x128xf32>
    %245 = math.tanh %244 : vector<1x128xf32>
    %cst_89 = arith.constant 1.000000e+00 : f32
    %246 = vector.broadcast %cst_89 : f32 to vector<1x128xf32>
    %247 = arith.addf %245, %246 : vector<1x128xf32>
    %cst_90 = arith.constant 5.000000e-01 : f32
    %248 = vector.broadcast %cst_90 : f32 to vector<1x128xf32>
    %249 = arith.mulf %248, %247 : vector<1x128xf32>
    %250 = vector.extract_strided_slice %233 {offsets = [0, 256], sizes = [1, 128], strides = [1, 1]} : vector<1x512xf32> to vector<1x128xf32>
    %251 = math.tanh %250 : vector<1x128xf32>
    %252 = vector.extract_strided_slice %233 {offsets = [0, 384], sizes = [1, 128], strides = [1, 1]} : vector<1x512xf32> to vector<1x128xf32>
    %cst_91 = arith.constant 5.000000e-01 : f32
    %253 = vector.broadcast %cst_91 : f32 to vector<1x128xf32>
    %254 = arith.mulf %253, %252 : vector<1x128xf32>
    %255 = math.tanh %254 : vector<1x128xf32>
    %cst_92 = arith.constant 1.000000e+00 : f32
    %256 = vector.broadcast %cst_92 : f32 to vector<1x128xf32>
    %257 = arith.addf %255, %256 : vector<1x128xf32>
    %cst_93 = arith.constant 5.000000e-01 : f32
    %258 = vector.broadcast %cst_93 : f32 to vector<1x128xf32>
    %259 = arith.mulf %258, %257 : vector<1x128xf32>
    %260 = arith.mulf %249, %227 : vector<1x128xf32>
    %261 = arith.mulf %241, %251 : vector<1x128xf32>
    %262 = arith.addf %260, %261 : vector<1x128xf32>
    %263 = math.tanh %262 : vector<1x128xf32>
    %264 = arith.mulf %259, %263 : vector<1x128xf32>
    %c6 = arith.constant 6 : index
    %c0_94 = arith.constant 0 : index
    %265 = vector.load %arg7[%c6, %c0_94] : memref<8x128xf32, #tpu.memory_space<vmem>>, vector<1x128xf32>
    tpu.vector_store %arg7[%c6, %c0_94], %264 {strides = array<i32>} : memref<8x128xf32, #tpu.memory_space<vmem>>, vector<1x128xf32>,
    %cst_95 = arith.constant dense<0.000000e+00> : vector<1x512xf32>
    %266 = tpu.matmul %264, %18, %cst_95 {dimension_numbers = #tpu.dot_dimension_numbers<[1], [0], [0], [1], [0, 0, 1, 1], [], []>} : vector<1x128xf32>, vector<128x512xf32>, vector<1x512xf32> -> vector<1x512xf32>
    %267 = vector.extract_strided_slice %17 {offsets = [7, 0], sizes = [1, 512], strides = [1, 1]} : vector<8x512xf32> to vector<1x512xf32>
    %268 = arith.addf %266, %267 : vector<1x512xf32>
    %269 = vector.extract_strided_slice %268 {offsets = [0, 0], sizes = [1, 128], strides = [1, 1]} : vector<1x512xf32> to vector<1x128xf32>
    %cst_96 = arith.constant 5.000000e-01 : f32
    %270 = vector.broadcast %cst_96 : f32 to vector<1x128xf32>
    %271 = arith.mulf %270, %269 : vector<1x128xf32>
    %272 = math.tanh %271 : vector<1x128xf32>
    %cst_97 = arith.constant 1.000000e+00 : f32
    %273 = vector.broadcast %cst_97 : f32 to vector<1x128xf32>
    %274 = arith.addf %272, %273 : vector<1x128xf32>
    %cst_98 = arith.constant 5.000000e-01 : f32
    %275 = vector.broadcast %cst_98 : f32 to vector<1x128xf32>
    %276 = arith.mulf %275, %274 : vector<1x128xf32>
    %277 = vector.extract_strided_slice %268 {offsets = [0, 128], sizes = [1, 128], strides = [1, 1]} : vector<1x512xf32> to vector<1x128xf32>
    %cst_99 = arith.constant 5.000000e-01 : f32
    %278 = vector.broadcast %cst_99 : f32 to vector<1x128xf32>
    %279 = arith.mulf %278, %277 : vector<1x128xf32>
    %280 = math.tanh %279 : vector<1x128xf32>
    %cst_100 = arith.constant 1.000000e+00 : f32
    %281 = vector.broadcast %cst_100 : f32 to vector<1x128xf32>
    %282 = arith.addf %280, %281 : vector<1x128xf32>
    %cst_101 = arith.constant 5.000000e-01 : f32
    %283 = vector.broadcast %cst_101 : f32 to vector<1x128xf32>
    %284 = arith.mulf %283, %282 : vector<1x128xf32>
    %285 = vector.extract_strided_slice %268 {offsets = [0, 256], sizes = [1, 128], strides = [1, 1]} : vector<1x512xf32> to vector<1x128xf32>
    %286 = math.tanh %285 : vector<1x128xf32>
    %287 = vector.extract_strided_slice %268 {offsets = [0, 384], sizes = [1, 128], strides = [1, 1]} : vector<1x512xf32> to vector<1x128xf32>
    %cst_102 = arith.constant 5.000000e-01 : f32
    %288 = vector.broadcast %cst_102 : f32 to vector<1x128xf32>
    %289 = arith.mulf %288, %287 : vector<1x128xf32>
    %290 = math.tanh %289 : vector<1x128xf32>
    %cst_103 = arith.constant 1.000000e+00 : f32
    %291 = vector.broadcast %cst_103 : f32 to vector<1x128xf32>
    %292 = arith.addf %290, %291 : vector<1x128xf32>
    %cst_104 = arith.constant 5.000000e-01 : f32
    %293 = vector.broadcast %cst_104 : f32 to vector<1x128xf32>
    %294 = arith.mulf %293, %292 : vector<1x128xf32>
    %295 = arith.mulf %284, %262 : vector<1x128xf32>
    %296 = arith.mulf %276, %286 : vector<1x128xf32>
    %297 = arith.addf %295, %296 : vector<1x128xf32>
    %298 = math.tanh %297 : vector<1x128xf32>
    %299 = arith.mulf %294, %298 : vector<1x128xf32>
    %c7 = arith.constant 7 : index
    %c0_105 = arith.constant 0 : index
    %300 = vector.load %arg7[%c7, %c0_105] : memref<8x128xf32, #tpu.memory_space<vmem>>, vector<1x128xf32>
    tpu.vector_store %arg7[%c7, %c0_105], %299 {strides = array<i32>} : memref<8x128xf32, #tpu.memory_space<vmem>>, vector<1x128xf32>,
    %c0_106 = arith.constant 0 : index
    %c0_107 = arith.constant 0 : index
    %301 = vector.load %arg7[%c0_106, %c0_107] : memref<8x128xf32, #tpu.memory_space<vmem>>, vector<8x128xf32>
    %302 = math.tanh %301 : vector<8x128xf32>
    %c0_108 = arith.constant 0 : index
    %c0_109 = arith.constant 0 : index
    %303 = vector.load %arg5[%c0_108, %c0_109] : memref<168x16xf32, #tpu.memory_space<vmem>>, vector<128x16xf32>
    %cst_110 = arith.constant dense<0.000000e+00> : vector<8x16xf32>
    %304 = tpu.matmul %302, %303, %cst_110 {dimension_numbers = #tpu.dot_dimension_numbers<[1], [0], [0], [1], [0, 0, 1, 1], [], []>} : vector<8x128xf32>, vector<128x16xf32>, vector<8x16xf32> -> vector<8x16xf32>
    %305 = vector.extract_strided_slice %304 {offsets = [0, 0], sizes = [8, 8], strides = [1, 1]} : vector<8x16xf32> to vector<8x8xf32>
    %306 = vector.extract_strided_slice %304 {offsets = [0, 8], sizes = [8, 8], strides = [1, 1]} : vector<8x16xf32> to vector<8x8xf32>
    %307 = tpu.concatenate %305, %306 in 0 : vector<8x8xf32>, vector<8x8xf32> -> vector<16x8xf32>
    %c128 = arith.constant 128 : index
    %c0_111 = arith.constant 0 : index
    %308 = vector.load %arg5[%c128, %c0_111] : memref<168x16xf32, #tpu.memory_space<vmem>>, vector<16x16xf32>
    %cst_112 = arith.constant dense<0.000000e+00> : vector<16x8xf32>
    %309 = tpu.matmul %308, %307, %cst_112 {dimension_numbers = #tpu.dot_dimension_numbers<[1], [0], [0], [1], [0, 0, 1, 1], [], []>} : vector<16x16xf32>, vector<16x8xf32>, vector<16x8xf32> -> vector<16x8xf32>
    %c144 = arith.constant 144 : index
    %c0_113 = arith.constant 0 : index
    %310 = vector.load %arg5[%c144, %c0_113] : memref<168x16xf32, #tpu.memory_space<vmem>>, vector<16x1xf32>
    %311 = vector.broadcast %310 : vector<16x1xf32> to vector<16x8xf32>
    %312 = arith.addf %309, %311 : vector<16x8xf32>
    %cst_114 = arith.constant 5.000000e-01 : f32
    %313 = vector.broadcast %cst_114 : f32 to vector<16x8xf32>
    %314 = arith.mulf %313, %312 : vector<16x8xf32>
    %315 = math.tanh %314 : vector<16x8xf32>
    %cst_115 = arith.constant 1.000000e+00 : f32
    %316 = vector.broadcast %cst_115 : f32 to vector<16x8xf32>
    %317 = arith.addf %315, %316 : vector<16x8xf32>
    %cst_116 = arith.constant 5.000000e-01 : f32
    %318 = vector.broadcast %cst_116 : f32 to vector<16x8xf32>
    %319 = arith.mulf %318, %317 : vector<16x8xf32>
    %c0_117 = arith.constant 0 : index
    %c0_118 = arith.constant 0 : index
    %320 = vector.load %arg6[%c0_117, %c0_118] : memref<16x8xf32, #tpu.memory_space<vmem>>, vector<16x8xf32>
    tpu.vector_store %arg6[%c0_117, %c0_118], %319 {strides = array<i32>} : memref<16x8xf32, #tpu.memory_space<vmem>>, vector<16x8xf32>,
    return
  }
}

</mosaic_0001>

<bundles_post_ra>
// kernel: reverse
= control target key start
LH: loop header
LB: loop body
LE: loop exit
PB: predicated region body
PF: predicated region fallthrough
CT: control target
= control target key end

     0   :  { %v2_v0 = vlaneseq  ;;  %s119_s0 = inlined_call_operand.vmem [shape: f32[16,8], index: 0, kind: input, shape index: {}]   ;;  %s120_s1 = inlined_call_operand.vmem [shape: f32[16,8], index: 1, kind: output, shape index: {}]  }
   0x1   :  { %v35_v2 = vld [vmem:[%s119_s0] sm:$0xff]  ;;  %v37_v3 = vld [vmem:[%s119_s0 + $0x8] sm:$0xff] }
   0x2   :  { %v3_v1 = vsub.s32 7, %v2_v0 }
   0x4   :  { %4 = vset.pattern.permute.xlu0 %v3_v1 }
   0x5   :  { %43 = vperm.xlu0 %4, %v35_v2  }
   0xd   :  { %49 = vperm.xlu0 %4, %v37_v3  }
  0x77   :  { %v44_v4 = vpop.permute.xlu0 %43 }
  0x78   :  { %83 = vst [vmem:[%s120_s1] sm:$0xff] %v44_v4 }
  0x7f   :  { %v50_v5 = vpop.permute.xlu0 %49 }
  0x80   :  { %85 = vst [vmem:[%s120_s1 + $0x8] sm:$0xff] %v50_v5 }

// kernel: cnn_lstm_forward.1
= control target key start
LH: loop header
LB: loop body
LE: loop exit
PB: predicated region body
PF: predicated region fallthrough
CT: control target
= control target key end

     0   :  { %vm31_vm0 = vcmask 457728   ;;  %vm60_vm1 = vcmask 64512   ;;  %s1560_s24 = smov 120   ;;  %vm1354_vm2 = vcmask 130048   ;;  %s3307_s0 = inlined_call_operand.vmem [shape: f32[56,128], index: 0, kind: input, shape index: {}]   ;;  %s3308_s2 = inlined_call_operand.vmem [shape: f32[256,512], index: 2, kind: input, shape index: {}]   ;;  %s3309_s1 = inlined_call_operand.vmem [shape: f32[8,56], index: 1, kind: input, shape index: {}]   ;;  %s3310_s5 = inlined_call_operand.vmem [shape: f32[168,16], index: 5, kind: input, shape index: {}]   ;;  %s3311_s4 = inlined_call_operand.vmem [shape: f32[128,512], index: 4, kind: input, shape index: {}]   ;;  %s3312_s3 = inlined_call_operand.vmem [shape: f32[1,512], index: 3, kind: input, shape index: {}]   ;;  %s3313_s6 = inlined_call_operand.vmem [shape: f32[16,8], index: 6, kind: output, shape index: {}]  }
   0x1   :  { %v30_v0 = vld [vmem:[%s3307_s0 + $0x30] sm:$0xff]  ;;  %v29_v1 = vld [vmem:[%s3307_s0 + $0x28] sm:$0xff]  ;;  %v28_v2 = vld [vmem:[%s3307_s0 + $0x20] sm:$0xff] }
   0x2   :  { %44 = vmatpush.msra.mxu0 %v30_v0  ;;  %v144_v3 = vld [vmem:[%s3308_s2 + $0x1e0] sm:$0xff]  ;;  %v27_v5 = vld [vmem:[%s3307_s0 + $0x18] sm:$0xff]  ;;  %v26_v7 = vld [vmem:[%s3307_s0 + $0x10] sm:$0xff] }
   0x3   :  { %222 = vmatpush.msra.mxu2 %v144_v3  ;;  %v140_v4 = vld [vmem:[%s3308_s2 + $0x1c0] sm:$0xff]  ;;  %v25_v9 = vld [vmem:[%s3307_s0 + $0x8] sm:$0xff]  ;;  %v146_v24 = vld [vmem:[%s3308_s2 + $0x1f0] sm:$0xff] }
   0x4   :  { %45 = vmatpush.msra.mxu0 %v29_v1  ;;  %v136_v6 = vld [vmem:[%s3308_s2 + $0x1a0] sm:$0xff]  ;;  %v142_v25 = vld [vmem:[%s3308_s2 + $0x1d0] sm:$0xff]  ;;  %v145_v46 = vld [vmem:[%s3308_s2 + $0x1e8] sm:$0xff] }
   0x5   :  { %223 = vmatpush.msra.mxu2 %v140_v4  ;;  %v132_v8 = vld [vmem:[%s3308_s2 + $0x180] sm:$0xff]  ;;  %v138_v26 = vld [vmem:[%s3308_s2 + $0x1b0] sm:$0xff]  ;;  %v141_v47 = vld [vmem:[%s3308_s2 + $0x1c8] sm:$0xff] }
   0x6   :  { %46 = vmatpush.msra.mxu0 %v28_v2  ;;  %v128_v10 = vld [vmem:[%s3308_s2 + $0x160] sm:$0xff]  ;;  %v134_v27 = vld [vmem:[%s3308_s2 + $0x190] sm:$0xff]  ;;  %v137_v48 = vld [vmem:[%s3308_s2 + $0x1a8] sm:$0xff] }
   0x7   :  { %224 = vmatpush.msra.mxu2 %v136_v6  ;;  %v24_v11 = vld [vmem:[%s3307_s0] sm:$0xff]  ;;  %v130_v28 = vld [vmem:[%s3308_s2 + $0x170] sm:$0xff]  ;;  %v133_v49 = vld [vmem:[%s3308_s2 + $0x188] sm:$0xff] }
   0x8   :  { %47 = vmatpush.msra.mxu0 %v27_v5  ;;  %v124_v12 = vld [vmem:[%s3308_s2 + $0x140] sm:$0xff]  ;;  %v126_v29 = vld [vmem:[%s3308_s2 + $0x150] sm:$0xff]  ;;  %v129_v50 = vld [vmem:[%s3308_s2 + $0x168] sm:$0xff] }
   0x9   :  { %225 = vmatpush.msra.mxu2 %v132_v8  ;;  %v23_v13 = vld [vmem:[%s3309_s1] sm:$0xff]  ;;  %v122_v30 = vld [vmem:[%s3308_s2 + $0x130] sm:$0xff]  ;;  %v125_v51 = vld [vmem:[%s3308_s2 + $0x148] sm:$0xff] }
   0xa   :  { %48 = vmatpush.msra.mxu0 %v26_v7  ;;  %v120_v14 = vld [vmem:[%s3308_s2 + $0x120] sm:$0xff]  ;;  %v118_v31 = vld [vmem:[%s3308_s2 + $0x110] sm:$0xff]  ;;  %v121_v52 = vld [vmem:[%s3308_s2 + $0x128] sm:$0xff] }
   0xb   :  { %226 = vmatpush.msra.mxu2 %v128_v10  ;;  %v116_v15 = vld [vmem:[%s3308_s2 + $0x100] sm:$0xff]  ;;  %v114_v32 = vld [vmem:[%s3308_s2 + $0xf0] sm:$0xff]  ;;  %v117_v53 = vld [vmem:[%s3308_s2 + $0x108] sm:$0xff] }
   0xc   :  { %49 = vmatpush.msra.mxu0 %v25_v9  ;;  %v112_v16 = vld [vmem:[%s3308_s2 + $0xe0] sm:$0xff]  ;;  %v110_v33 = vld [vmem:[%s3308_s2 + $0xd0] sm:$0xff]  ;;  %v113_v54 = vld [vmem:[%s3308_s2 + $0xe8] sm:$0xff] }
   0xd   :  { %227 = vmatpush.msra.mxu2 %v124_v12  ;;  %v108_v17 = vld [vmem:[%s3308_s2 + $0xc0] sm:$0xff]  ;;  %v106_v34 = vld [vmem:[%s3308_s2 + $0xb0] sm:$0xff]  ;;  %v109_v55 = vld [vmem:[%s3308_s2 + $0xc8] sm:$0xff] }
   0xe   :  { %50 = vmatpush.msra.mxu0 %v24_v11  ;;  %v104_v18 = vld [vmem:[%s3308_s2 + $0xa0] sm:$0xff]  ;;  %v102_v35 = vld [vmem:[%s3308_s2 + $0x90] sm:$0xff]  ;;  %v105_v56 = vld [vmem:[%s3308_s2 + $0xa8] sm:$0xff] }
   0xf   :  { %1398 = vmatmul.msk.f32.vlgmr.msra.gmra.mxu0 %vm31_vm0, %v23_v13  ;;  %228 = vmatpush.msra.mxu2 %v120_v14  ;;  %v100_v19 = vld [vmem:[%s3308_s2 + $0x80] sm:$0xff]  ;;  %v98_v36 = vld [vmem:[%s3308_s2 + $0x70] sm:$0xff]  ;;  %v101_v57 = vld [vmem:[%s3308_s2 + $0x88] sm:$0xff] }
  0x10   :  { %v96_v20 = vld [vmem:[%s3308_s2 + $0x60] sm:$0xff]  ;;  %v94_v37 = vld [vmem:[%s3308_s2 + $0x50] sm:$0xff]  ;;  %v97_v58 = vld [vmem:[%s3308_s2 + $0x68] sm:$0xff] }
  0x11   :  { %229 = vmatpush.msra.mxu2 %v116_v15  ;;  %v92_v21 = vld [vmem:[%s3308_s2 + $0x40] sm:$0xff]  ;;  %v90_v38 = vld [vmem:[%s3308_s2 + $0x30] sm:$0xff]  ;;  %v93_v59 = vld [vmem:[%s3308_s2 + $0x48] sm:$0xff] }
  0x12   :  { %v88_v22 = vld [vmem:[%s3308_s2 + $0x20] sm:$0xff]  ;;  %v86_v39 = vld [vmem:[%s3308_s2 + $0x10] sm:$0xff]  ;;  %v89_v60 = vld [vmem:[%s3308_s2 + $0x28] sm:$0xff] }
  0x13   :  { %230 = vmatpush.msra.mxu2 %v112_v16  ;;  %v84_v23 = vld [vmem:[%s3308_s2] sm:$0xff]  ;;  %v85_v61 = vld [vmem:[%s3308_s2 + $0x8] sm:$0xff]  ;;  %v147_v62 = vld [vmem:[%s3308_s2 + $0x1f8] sm:$0xff] }
  0x14   :  { %v59_v45 = vld [vmem:[%s3310_s5 + $0xa0] sm:$0xff]  ;;  %v143_v63 = vld [vmem:[%s3308_s2 + $0x1d8] sm:$0xff]  ;;  %v209_v1 = vld [vmem:[%s3308_s2 + $0x3e8] sm:$0xff] }
  0x15   :  { %231 = vmatpush.msra.mxu2 %v108_v17  ;;  %v208_v0 = vld [vmem:[%s3308_s2 + $0x3e0] sm:$0xff]  ;;  %v205_v3 = vld [vmem:[%s3308_s2 + $0x3c8] sm:$0xff]  ;;  %v139_v4 = vld [vmem:[%s3308_s2 + $0x1b8] sm:$0xff]  ;;  %282 = vmatpush.msrb.mxu0 %v209_v1 }
  0x16   :  { %v204_v2 = vld [vmem:[%s3308_s2 + $0x3c0] sm:$0xff]  ;;  %242 = vmatpush.msra.mxu3 %v208_v0  ;;  %v201_v6 = vld [vmem:[%s3308_s2 + $0x3a8] sm:$0xff]  ;;  %v135_v7 = vld [vmem:[%s3308_s2 + $0x198] sm:$0xff] }
  0x17   :  { %232 = vmatpush.msra.mxu2 %v104_v18  ;;  %v200_v5 = vld [vmem:[%s3308_s2 + $0x3a0] sm:$0xff]  ;;  %283 = vmatpush.msrb.mxu0 %v205_v3  ;;  %v197_v9 = vld [vmem:[%s3308_s2 + $0x388] sm:$0xff]  ;;  %v131_v10 = vld [vmem:[%s3308_s2 + $0x178] sm:$0xff] }
  0x18   :  { %243 = vmatpush.msra.mxu3 %v204_v2  ;;  %v196_v8 = vld [vmem:[%s3308_s2 + $0x380] sm:$0xff]  ;;  %v193_v12 = vld [vmem:[%s3308_s2 + $0x368] sm:$0xff]  ;;  %v127_v13 = vld [vmem:[%s3308_s2 + $0x158] sm:$0xff] }
  0x19   :  { %233 = vmatpush.msra.mxu2 %v100_v19  ;;  %284 = vmatpush.msrb.mxu0 %v201_v6  ;;  %v192_v11 = vld [vmem:[%s3308_s2 + $0x360] sm:$0xff]  ;;  %v189_v15 = vld [vmem:[%s3308_s2 + $0x348] sm:$0xff]  ;;  %v123_v16 = vld [vmem:[%s3308_s2 + $0x138] sm:$0xff] }
  0x1a   :  { %244 = vmatpush.msra.mxu3 %v200_v5  ;;  %v188_v14 = vld [vmem:[%s3308_s2 + $0x340] sm:$0xff]  ;;  %v185_v18 = vld [vmem:[%s3308_s2 + $0x328] sm:$0xff]  ;;  %v119_v19 = vld [vmem:[%s3308_s2 + $0x118] sm:$0xff] }
  0x1b   :  { %234 = vmatpush.msra.mxu2 %v96_v20  ;;  %285 = vmatpush.msrb.mxu0 %v197_v9  ;;  %v184_v17 = vld [vmem:[%s3308_s2 + $0x320] sm:$0xff]  ;;  %v203_v0 = vld [vmem:[%s3308_s2 + $0x3b8] sm:$0xff]  ;;  %v2017_v1 = vld [vmem:[%s3311_s4 + $0x1b0] sm:$0xff] }
  0x1c   :  { %245 = vmatpush.msra.mxu3 %v196_v8  ;;  %v180_v20 = vld [vmem:[%s3308_s2 + $0x300] sm:$0xff]  ;;  %v198_v3 = vld [vmem:[%s3308_s2 + $0x390] sm:$0xff]  ;;  %v195_v8 = vld [vmem:[%s3308_s2 + $0x378] sm:$0xff] }
  0x1d   :  { %235 = vmatpush.msra.mxu2 %v92_v21  ;;  %286 = vmatpush.msrb.mxu0 %v193_v12  ;;  %v1847_v21 = vld [vmem:[%s3311_s4 + $0x1e0] sm:$0xff]  ;;  %v2035_v5 = vld [vmem:[%s3311_s4 + $0x190] sm:$0xff]  ;;  %v191_v12 = vld [vmem:[%s3308_s2 + $0x358] sm:$0xff] }
  0x1e   :  { %246 = vmatpush.msra.mxu3 %v192_v11  ;;  %v2022_v2 = vld [vmem:[%s3311_s4 + $0x80] sm:$0xff]  ;;  %v2053_v9 = vld [vmem:[%s3311_s4 + $0x170] sm:$0xff] }
  0x1f   :  { %236 = vmatpush.msra.mxu2 %v88_v22  ;;  %287 = vmatpush.msrb.mxu0 %v189_v15  ;;  %v181_v22 = vld [vmem:[%s3308_s2 + $0x308] sm:$0xff]  ;;  %3402 = vst [vmem:[#allocation5_spill] sm:$0xff] %v2022_v2  ;;  %v2040_v6 = vld [vmem:[%s3311_s4 + $0x60] sm:$0xff]  ;;  %v190_v11 = vld [vmem:[%s3308_s2 + $0x350] sm:$0xff] }
  0x20   :  { %247 = vmatpush.msra.mxu3 %v188_v14  ;;  %3403 = vst [vmem:[#allocation6_spill] sm:$0xff] %v2040_v6  ;;  %v186_v14 = vld [vmem:[%s3308_s2 + $0x330] sm:$0xff]  ;;  %v187_v15 = vld [vmem:[%s3308_s2 + $0x338] sm:$0xff] }
  0x21   :  { %237 = vmatpush.msra.mxu2 %v84_v23  ;;  %v1855_v23 = vld [vmem:[%s3311_s4 + $0x1c0] sm:$0xff]  ;;  %288 = vmatpush.msrb.mxu0 %v185_v18  ;;  %v183_v18 = vld [vmem:[%s3308_s2 + $0x318] sm:$0xff] }
  0x22   :  { %248 = vmatpush.msra.mxu3 %v184_v17  ;;  %v182_v17 = vld [vmem:[%s3308_s2 + $0x310] sm:$0xff] }
  0x23   :  { %302 = vmatpush.msrb.mxu2 %v146_v24  ;;  %v115_v24 = vld [vmem:[%s3308_s2 + $0xf8] sm:$0xff]  ;;  %289 = vmatpush.msrb.mxu0 %v181_v22  ;;  %v174_v22 = vld [vmem:[%s3308_s2 + $0x2d0] sm:$0xff] }
  0x24   :  { %249 = vmatpush.msra.mxu3 %v180_v20  ;;  %v179_v20 = vld [vmem:[%s3308_s2 + $0x2f8] sm:$0xff] }
  0x25   :  { %303 = vmatpush.msrb.mxu2 %v142_v25  ;;  %v176_v25 = vld [vmem:[%s3308_s2 + $0x2e0] sm:$0xff] }
  0x26   :  { %250 = vmatpush.msra.mxu3 %v176_v25  ;;  %v170_v25 = vld [vmem:[%s3308_s2 + $0x2b0] sm:$0xff] }
  0x27   :  { %304 = vmatpush.msrb.mxu2 %v138_v26  ;;  %v177_v26 = vld [vmem:[%s3308_s2 + $0x2e8] sm:$0xff] }
  0x28   :  { %290 = vmatpush.msrb.mxu0 %v177_v26  ;;  %v171_v26 = vld [vmem:[%s3308_s2 + $0x2b8] sm:$0xff] }
  0x29   :  { %305 = vmatpush.msrb.mxu2 %v134_v27  ;;  %v1870_v27 = vld [vmem:[%s3311_s4 + $0x1a0] sm:$0xff] }
  0x2b   :  { %306 = vmatpush.msrb.mxu2 %v130_v28  ;;  %v111_v28 = vld [vmem:[%s3308_s2 + $0xd8] sm:$0xff] }
  0x2d   :  { %307 = vmatpush.msrb.mxu2 %v126_v29  ;;  %v172_v29 = vld [vmem:[%s3308_s2 + $0x2c0] sm:$0xff] }
  0x2e   :  { %251 = vmatpush.msra.mxu3 %v172_v29  ;;  %v167_v29 = vld [vmem:[%s3308_s2 + $0x298] sm:$0xff] }
  0x2f   :  { %308 = vmatpush.msrb.mxu2 %v122_v30  ;;  %v173_v30 = vld [vmem:[%s3308_s2 + $0x2c8] sm:$0xff] }
  0x30   :  { %291 = vmatpush.msrb.mxu0 %v173_v30  ;;  %v162_v30 = vld [vmem:[%s3308_s2 + $0x270] sm:$0xff] }
  0x31   :  { %309 = vmatpush.msrb.mxu2 %v118_v31  ;;  %v1885_v31 = vld [vmem:[%s3311_s4 + $0x180] sm:$0xff] }
  0x33   :  { %310 = vmatpush.msrb.mxu2 %v114_v32  ;;  %v107_v32 = vld [vmem:[%s3308_s2 + $0xb8] sm:$0xff] }
  0x35   :  { %311 = vmatpush.msrb.mxu2 %v110_v33  ;;  %v168_v33 = vld [vmem:[%s3308_s2 + $0x2a0] sm:$0xff] }
  0x36   :  { %252 = vmatpush.msra.mxu3 %v168_v33  ;;  %v158_v33 = vld [vmem:[%s3308_s2 + $0x250] sm:$0xff] }
  0x37   :  { %312 = vmatpush.msrb.mxu2 %v106_v34  ;;  %v169_v34 = vld [vmem:[%s3308_s2 + $0x2a8] sm:$0xff] }
  0x38   :  { %292 = vmatpush.msrb.mxu0 %v169_v34  ;;  %v159_v34 = vld [vmem:[%s3308_s2 + $0x258] sm:$0xff] }
  0x39   :  { %313 = vmatpush.msrb.mxu2 %v102_v35  ;;  %v1900_v35 = vld [vmem:[%s3311_s4 + $0x160] sm:$0xff] }
  0x3b   :  { %314 = vmatpush.msrb.mxu2 %v98_v36  ;;  %v103_v36 = vld [vmem:[%s3308_s2 + $0x98] sm:$0xff] }
  0x3d   :  { %315 = vmatpush.msrb.mxu2 %v94_v37  ;;  %v164_v37 = vld [vmem:[%s3308_s2 + $0x280] sm:$0xff] }
  0x3e   :  { %253 = vmatpush.msra.mxu3 %v164_v37  ;;  %v155_v37 = vld [vmem:[%s3308_s2 + $0x238] sm:$0xff] }
  0x3f   :  { %316 = vmatpush.msrb.mxu2 %v90_v38  ;;  %v165_v38 = vld [vmem:[%s3308_s2 + $0x288] sm:$0xff] }
  0x40   :  { %293 = vmatpush.msrb.mxu0 %v165_v38  ;;  %v150_v38 = vld [vmem:[%s3308_s2 + $0x210] sm:$0xff] }
  0x41   :  { %317 = vmatpush.msrb.mxu2 %v86_v39  ;;  %v1915_v39 = vld [vmem:[%s3311_s4 + $0x140] sm:$0xff] }
  0x8c   :  { %v52_v40 = vpop.f32.mrf.mxu0 }
  0x8d   :  { %v55_v41 = vmul.f32 0.5, %v52_v40  ;;  %v99_v40 = vld [vmem:[%s3308_s2 + $0x78] sm:$0xff] }
  0x8f   :  { %1407 = vtanh.f32 %v55_v41  ;;  %v160_v41 = vld [vmem:[%s3308_s2 + $0x260] sm:$0xff] }
  0x90   :  { %254 = vmatpush.msra.mxu3 %v160_v41  ;;  %v2145_v41 = vld [vmem:[%s3311_s4 + $0x20] sm:$0xff] }
  0x91   :  { %3405 = vst [vmem:[#allocation8_spill] sm:$0xff] %v2145_v41 }
  0x95   :  { %v1408_v42 = vpop.eup %1407 }
  0x96   :  { %v57_v43 = vadd.f32 1.0, %v1408_v42  ;;  %v161_v42 = vld [vmem:[%s3308_s2 + $0x268] sm:$0xff] }
  0x97   :  { %294 = vmatpush.msrb.mxu0 %v161_v42  ;;  %v2151_v42 = vld [vmem:[%s3311_s4 + $0x110] sm:$0xff] }
  0x98   :  { %v1717_v44 = vmul.f32 0.5, %v57_v43  ;;  %v1930_v43 = vld [vmem:[%s3311_s4 + $0x120] sm:$0xff] }
  0x9a   :  { %79 = vmatpush.msra.mxu1 %v1717_v44  ;;  %238 = vmatmul.f32.vlgmr.msra.gmra.mxu2 %v1717_v44 }
  0x9b   :  { %1399 = vmatmul.msk.f32.vlgmr.msra.gmra.mxu1 %vm60_vm1, %v59_v45  ;;  %446 = vmatpush.msra.mxu2 %v1847_v21  ;;  %v95_v45 = vld [vmem:[%s3308_s2 + $0x58] sm:$0xff] }
  0x9c   :  { %262 = vmatpush.msrb.mxu1 %v145_v46  ;;  %v156_v46 = vld [vmem:[%s3308_s2 + $0x240] sm:$0xff] }
  0x9d   :  { %447 = vmatpush.msra.mxu2 %v1855_v23  ;;  %255 = vmatpush.msra.mxu3 %v156_v46  ;;  %v2161_v46 = vld [vmem:[%s3311_s4 + $0xf0] sm:$0xff] }
  0x9e   :  { %263 = vmatpush.msrb.mxu1 %v141_v47  ;;  %v157_v47 = vld [vmem:[%s3308_s2 + $0x248] sm:$0xff] }
  0x9f   :  { %448 = vmatpush.msra.mxu2 %v1870_v27  ;;  %295 = vmatpush.msrb.mxu0 %v157_v47  ;;  %v3314_v47 = vmov 0.0  }
  0xa0   :  { %264 = vmatpush.msrb.mxu1 %v137_v48  ;;  %v1945_v48 = vld [vmem:[%s3311_s4 + $0x100] sm:$0xff] }
  0xa1   :  { %449 = vmatpush.msra.mxu2 %v1885_v31 }
  0xa2   :  { %265 = vmatpush.msrb.mxu1 %v133_v49  ;;  %318 = vmatmul.f32.vlgmr.msrb.gmra.mxu2 %v1717_v44  ;;  %v91_v49 = vld [vmem:[%s3308_s2 + $0x38] sm:$0xff] }
  0xa3   :  { %450 = vmatpush.msra.mxu2 %v1900_v35 }
  0xa4   :  { %266 = vmatpush.msrb.mxu1 %v129_v50  ;;  %v152_v50 = vld [vmem:[%s3308_s2 + $0x220] sm:$0xff] }
  0xa5   :  { %451 = vmatpush.msra.mxu2 %v1915_v39  ;;  %256 = vmatpush.msra.mxu3 %v152_v50  ;;  %v2176_v50 = vld [vmem:[%s3311_s4 + $0xb0] sm:$0xff] }
  0xa6   :  { %267 = vmatpush.msrb.mxu1 %v125_v51  ;;  %v153_v51 = vld [vmem:[%s3308_s2 + $0x228] sm:$0xff]  ;;  %3407 = vst [vmem:[#allocation10_spill] sm:$0xff] %v2176_v50 }
  0xa7   :  { %452 = vmatpush.msra.mxu2 %v1930_v43  ;;  %296 = vmatpush.msrb.mxu0 %v153_v51  ;;  %v2183_v51 = vld [vmem:[%s3311_s4 + $0x90] sm:$0xff] }
  0xa8   :  { %268 = vmatpush.msrb.mxu1 %v121_v52  ;;  %v1960_v52 = vld [vmem:[%s3311_s4 + $0xe0] sm:$0xff]  ;;  %3408 = vst [vmem:[#allocation11_spill] sm:$0xff] %v2183_v51 }
  0xa9   :  { %453 = vmatpush.msra.mxu2 %v1945_v48 }
  0xaa   :  { %269 = vmatpush.msrb.mxu1 %v117_v53  ;;  %v87_v53 = vld [vmem:[%s3308_s2 + $0x18] sm:$0xff] }
  0xab   :  { %454 = vmatpush.msra.mxu2 %v1960_v52 }
  0xac   :  { %270 = vmatpush.msrb.mxu1 %v113_v54  ;;  %v148_v54 = vld [vmem:[%s3308_s2 + $0x200] sm:$0xff] }
  0xad   :  { %257 = vmatpush.msra.mxu3 %v148_v54  ;;  %v2197_v54 = vld [vmem:[%s3311_s4 + $0x50] sm:$0xff] }
  0xae   :  { %271 = vmatpush.msrb.mxu1 %v109_v55  ;;  %v149_v55 = vld [vmem:[%s3308_s2 + $0x208] sm:$0xff]  ;;  %3410 = vst [vmem:[#allocation13_spill] sm:$0xff] %v2197_v54 }
  0xaf   :  { %297 = vmatpush.msrb.mxu0 %v149_v55  ;;  %v2204_v55 = vld [vmem:[%s3311_s4 + $0x30] sm:$0xff] }
  0xb0   :  { %272 = vmatpush.msrb.mxu1 %v105_v56  ;;  %v210_v56 = vld [vmem:[%s3308_s2 + $0x3f0] sm:$0xff]  ;;  %3411 = vst [vmem:[#allocation14_spill] sm:$0xff] %v2204_v55 }
  0xb1   :  { %322 = vmatpush.msrb.mxu3 %v210_v56  ;;  %v2211_v56 = vld [vmem:[%s3311_s4 + $0x10] sm:$0xff] }
  0xb2   :  { %273 = vmatpush.msrb.mxu1 %v101_v57  ;;  %v211_v57 = vld [vmem:[%s3308_s2 + $0x3f8] sm:$0xff]  ;;  %3412 = vst [vmem:[#allocation15_spill] sm:$0xff] %v2211_v56 }
  0xb3   :  { %362 = vmatpush.msra.mxu0 %v211_v57  ;;  %v2231_v57 = vld [vmem:[%s3311_s4 + $0x1e8] sm:$0xff] }
  0xb4   :  { %274 = vmatpush.msrb.mxu1 %v97_v58  ;;  %v1982_v58 = vld [vmem:[%s3311_s4 + $0x1f0] sm:$0xff] }
  0xb6   :  { %275 = vmatpush.msrb.mxu1 %v93_v59  ;;  %v1987_v59 = vld [vmem:[%s3311_s4 + $0xc0] sm:$0xff] }
  0xb7   :  { %3400 = vst [vmem:[#allocation3_spill] sm:$0xff] %v1987_v59  ;;  %455 = vmatpush.msra.mxu2 %v1987_v59 }
  0xb8   :  { %276 = vmatpush.msrb.mxu1 %v89_v60  ;;  %v206_v60 = vld [vmem:[%s3308_s2 + $0x3d0] sm:$0xff] }
  0xb9   :  { %323 = vmatpush.msrb.mxu3 %v206_v60  ;;  %v2236_v60 = vld [vmem:[%s3311_s4 + $0x1f8] sm:$0xff] }
  0xba   :  { %277 = vmatpush.msrb.mxu1 %v85_v61  ;;  %v207_v61 = vld [vmem:[%s3308_s2 + $0x3d8] sm:$0xff] }
  0xbb   :  { %278 = vmatmul.f32.vlgmr.msrb.gmra.mxu1 %v1717_v44  ;;  %363 = vmatpush.msra.mxu0 %v207_v61 }
  0xbc   :  { %342 = vmatpush.msra.mxu1 %v147_v62  ;;  %v1999_v62 = vld [vmem:[%s3311_s4 + $0x1d0] sm:$0xff] }
  0xbd   :  { %364 = vmatpush.msra.mxu0 %v203_v0  ;;  %v2248_v0 = vld [vmem:[%s3311_s4 + $0x1d8] sm:$0xff] }
  0xbe   :  { %343 = vmatpush.msra.mxu1 %v143_v63  ;;  %v202_v63 = vld [vmem:[%s3308_s2 + $0x3b0] sm:$0xff] }
  0xbf   :  { %324 = vmatpush.msrb.mxu3 %v202_v63  ;;  %v2243_v63 = vld [vmem:[%s3311_s4 + $0x1c8] sm:$0xff] }
  0xc0   :  { %344 = vmatpush.msra.mxu1 %v139_v4  ;;  %v199_v4 = vld [vmem:[%s3308_s2 + $0x398] sm:$0xff] }
  0xc1   :  { %325 = vmatpush.msrb.mxu3 %v198_v3  ;;  %365 = vmatpush.msra.mxu0 %v199_v4  ;;  %v2255_v3 = vld [vmem:[%s3311_s4 + $0x1a8] sm:$0xff]  ;;  %v2260_v4 = vld [vmem:[%s3311_s4 + $0x1b8] sm:$0xff] }
  0xc2   :  { %345 = vmatpush.msra.mxu1 %v135_v7  ;;  %v194_v7 = vld [vmem:[%s3308_s2 + $0x370] sm:$0xff] }
  0xc3   :  { %326 = vmatpush.msrb.mxu3 %v194_v7  ;;  %366 = vmatpush.msra.mxu0 %v195_v8  ;;  %v2269_v7 = vld [vmem:[%s3311_s4 + $0x188] sm:$0xff]  ;;  %v2274_v8 = vld [vmem:[%s3311_s4 + $0x198] sm:$0xff] }
  0xc4   :  { %346 = vmatpush.msra.mxu1 %v131_v10  ;;  %v2058_v10 = vld [vmem:[%s3311_s4 + $0x40] sm:$0xff] }
  0xc5   :  { %3404 = vst [vmem:[#allocation7_spill] sm:$0xff] %v2058_v10  ;;  %327 = vmatpush.msrb.mxu3 %v190_v11  ;;  %367 = vmatpush.msra.mxu0 %v191_v12  ;;  %v2283_v11 = vld [vmem:[%s3311_s4 + $0x168] sm:$0xff]  ;;  %v2288_v12 = vld [vmem:[%s3311_s4 + $0x178] sm:$0xff] }
  0xc6   :  { %347 = vmatpush.msra.mxu1 %v127_v13  ;;  %v2071_v13 = vld [vmem:[%s3311_s4 + $0x150] sm:$0xff] }
  0xc7   :  { %328 = vmatpush.msrb.mxu3 %v186_v14  ;;  %368 = vmatpush.msra.mxu0 %v187_v15  ;;  %v2297_v14 = vld [vmem:[%s3311_s4 + $0x148] sm:$0xff]  ;;  %v2302_v15 = vld [vmem:[%s3311_s4 + $0x158] sm:$0xff] }
  0xc8   :  { %348 = vmatpush.msra.mxu1 %v123_v16  ;;  %v2084_v16 = vld [vmem:[%s3311_s4 + $0x130] sm:$0xff] }
  0xc9   :  { %329 = vmatpush.msrb.mxu3 %v182_v17  ;;  %369 = vmatpush.msra.mxu0 %v183_v18  ;;  %v2309_v17 = vld [vmem:[%s3311_s4 + $0x128] sm:$0xff]  ;;  %v2314_v18 = vld [vmem:[%s3311_s4 + $0x138] sm:$0xff] }
  0xca   :  { %349 = vmatpush.msra.mxu1 %v119_v19  ;;  %v178_v19 = vld [vmem:[%s3308_s2 + $0x2f0] sm:$0xff] }
  0xcb   :  { %330 = vmatpush.msrb.mxu3 %v178_v19  ;;  %370 = vmatpush.msra.mxu0 %v179_v20  ;;  %v2323_v19 = vld [vmem:[%s3311_s4 + $0x108] sm:$0xff]  ;;  %v2328_v20 = vld [vmem:[%s3311_s4 + $0x118] sm:$0xff] }
  0xcc   :  { %350 = vmatpush.msra.mxu1 %v115_v24  ;;  %v175_v24 = vld [vmem:[%s3308_s2 + $0x2d8] sm:$0xff] }
  0xcd   :  { %331 = vmatpush.msrb.mxu3 %v174_v22  ;;  %371 = vmatpush.msra.mxu0 %v175_v24  ;;  %v2337_v22 = vld [vmem:[%s3311_s4 + $0xe8] sm:$0xff]  ;;  %v2342_v24 = vld [vmem:[%s3311_s4 + $0xf8] sm:$0xff] }
  0xce   :  { %351 = vmatpush.msra.mxu1 %v111_v28  ;;  %v166_v28 = vld [vmem:[%s3308_s2 + $0x290] sm:$0xff] }
  0xcf   :  { %332 = vmatpush.msrb.mxu3 %v170_v25  ;;  %372 = vmatpush.msra.mxu0 %v171_v26  ;;  %v2351_v25 = vld [vmem:[%s3311_s4 + $0xc8] sm:$0xff]  ;;  %v2356_v26 = vld [vmem:[%s3311_s4 + $0xd8] sm:$0xff] }
  0xd0   :  { %352 = vmatpush.msra.mxu1 %v107_v32  ;;  %v163_v32 = vld [vmem:[%s3308_s2 + $0x278] sm:$0xff] }
  0xd1   :  { %333 = vmatpush.msrb.mxu3 %v166_v28  ;;  %373 = vmatpush.msra.mxu0 %v167_v29  ;;  %v2365_v28 = vld [vmem:[%s3311_s4 + $0xa8] sm:$0xff]  ;;  %v2370_v29 = vld [vmem:[%s3311_s4 + $0xb8] sm:$0xff] }
  0xd2   :  { %353 = vmatpush.msra.mxu1 %v103_v36  ;;  %v154_v36 = vld [vmem:[%s3308_s2 + $0x230] sm:$0xff]  ;;  %3413 = vst [vmem:[#allocation16_spill] sm:$0xff] %v2365_v28 }
  0xd3   :  { %334 = vmatpush.msrb.mxu3 %v162_v30  ;;  %374 = vmatpush.msra.mxu0 %v163_v32  ;;  %3414 = vst [vmem:[#allocation17_spill] sm:$0xff] %v2370_v29  ;;  %v2379_v30 = vld [vmem:[%s3311_s4 + $0x88] sm:$0xff]  ;;  %v2384_v32 = vld [vmem:[%s3311_s4 + $0x98] sm:$0xff] }
  0xd4   :  { %354 = vmatpush.msra.mxu1 %v99_v40  ;;  %v151_v40 = vld [vmem:[%s3308_s2 + $0x218] sm:$0xff]  ;;  %3415 = vst [vmem:[#allocation18_spill] sm:$0xff] %v2379_v30 }
  0xd5   :  { %335 = vmatpush.msrb.mxu3 %v158_v33  ;;  %375 = vmatpush.msra.mxu0 %v159_v34  ;;  %3416 = vst [vmem:[#allocation19_spill] sm:$0xff] %v2384_v32  ;;  %v2393_v33 = vld [vmem:[%s3311_s4 + $0x68] sm:$0xff]  ;;  %v2398_v34 = vld [vmem:[%s3311_s4 + $0x78] sm:$0xff] }
  0xd6   :  { %355 = vmatpush.msra.mxu1 %v95_v45  ;;  %v2156_v45 = vld [vmem:[%s3311_s4] sm:$0xff]  ;;  %3417 = vst [vmem:[#allocation20_spill] sm:$0xff] %v2393_v33 }
  0xd7   :  { %336 = vmatpush.msrb.mxu3 %v154_v36  ;;  %376 = vmatpush.msra.mxu0 %v155_v37  ;;  %3406 = vst [vmem:[#allocation9_spill] sm:$0xff] %v2156_v45  ;;  %v2407_v36 = vld [vmem:[%s3311_s4 + $0x48] sm:$0xff]  ;;  %v2412_v37 = vld [vmem:[%s3311_s4 + $0x58] sm:$0xff] }
  0xd8   :  { %356 = vmatpush.msra.mxu1 %v91_v49  ;;  %v2169_v49 = vld [vmem:[%s3311_s4 + $0xd0] sm:$0xff]  ;;  %3418 = vst [vmem:[#allocation21_spill] sm:$0xff] %v2398_v34 }
  0xd9   :  { %337 = vmatpush.msrb.mxu3 %v150_v38  ;;  %377 = vmatpush.msra.mxu0 %v151_v40  ;;  %3419 = vst [vmem:[#allocation22_spill] sm:$0xff] %v2407_v36  ;;  %v2421_v38 = vld [vmem:[%s3311_s4 + $0x28] sm:$0xff]  ;;  %v2426_v40 = vld [vmem:[%s3311_s4 + $0x38] sm:$0xff] }
  0xda   :  { %357 = vmatpush.msra.mxu1 %v87_v53  ;;  %v2190_v53 = vld [vmem:[%s3311_s4 + $0x70] sm:$0xff]  ;;  %3420 = vst [vmem:[#allocation23_spill] sm:$0xff] %v2412_v37 }
  0xdb   :  { %358 = vmatmul.f32.vlgmr.msra.gmra.mxu1 %v1717_v44  ;;  %v2004_v44 = vld [vmem:[%s3311_s4 + $0xa0] sm:$0xff]  ;;  %3409 = vst [vmem:[#allocation12_spill] sm:$0xff] %v2190_v53 }
  0xdc   :  { %3401 = vst [vmem:[#allocation4_spill] sm:$0xff] %v2004_v44  ;;  %486 = vmatpush.msrb.mxu1 %v1982_v58  ;;  %456 = vmatpush.msra.mxu2 %v2004_v44 }
  0xdd   :  { %3421 = vst [vmem:[#allocation24_spill] sm:$0xff] %v2421_v38 }
  0xde   :  { %487 = vmatpush.msrb.mxu1 %v1999_v62  ;;  %457 = vmatpush.msra.mxu2 %v2022_v2  ;;  %3422 = vst [vmem:[#allocation25_spill] sm:$0xff] %v2426_v40 }
  0xe0   :  { %488 = vmatpush.msrb.mxu1 %v2017_v1  ;;  %458 = vmatpush.msra.mxu2 %v2040_v6 }
  0xe2   :  { %489 = vmatpush.msrb.mxu1 %v2035_v5  ;;  %459 = vmatpush.msra.mxu2 %v2058_v10 }
  0xe4   :  { %490 = vmatpush.msrb.mxu1 %v2053_v9  ;;  %460 = vmatpush.msra.mxu2 %v2145_v41 }
  0xe6   :  { %491 = vmatpush.msrb.mxu1 %v2071_v13  ;;  %461 = vmatpush.msra.mxu2 %v2156_v45 }
  0xe7   :  { %462 = vmatmul.f32.vlgmr.msra.gmra.mxu2 %v3314_v47 }
  0xe8   :  { %492 = vmatpush.msrb.mxu1 %v2084_v16  ;;  %557 = vmatpush.msrb.mxu2 %v1847_v21 }
  0xea   :  { %493 = vmatpush.msrb.mxu1 %v2151_v42  ;;  %558 = vmatpush.msrb.mxu2 %v1855_v23 }
  0xec   :  { %494 = vmatpush.msrb.mxu1 %v2161_v46  ;;  %559 = vmatpush.msrb.mxu2 %v1870_v27 }
  0xee   :  { %495 = vmatpush.msrb.mxu1 %v2169_v49  ;;  %560 = vmatpush.msrb.mxu2 %v1885_v31 }
  0xf0   :  { %496 = vmatpush.msrb.mxu1 %v2176_v50  ;;  %561 = vmatpush.msrb.mxu2 %v1900_v35 }
  0xf2   :  { %497 = vmatpush.msrb.mxu1 %v2183_v51  ;;  %562 = vmatpush.msrb.mxu2 %v1915_v39 }
  0xf4   :  { %498 = vmatpush.msrb.mxu1 %v2190_v53  ;;  %563 = vmatpush.msrb.mxu2 %v1930_v43 }
  0xf6   :  { %499 = vmatpush.msrb.mxu1 %v2197_v54  ;;  %564 = vmatpush.msrb.mxu2 %v1945_v48 }
  0xf8   :  { %500 = vmatpush.msrb.mxu1 %v2204_v55  ;;  %565 = vmatpush.msrb.mxu2 %v1960_v52 }
  0xfa   :  { %501 = vmatpush.msrb.mxu1 %v2211_v56  ;;  %566 = vmatpush.msrb.mxu2 %v1987_v59 }
  0xfb   :  { %502 = vmatmul.f32.vlgmr.msrb.gmra.mxu1 %v3314_v47  ;;  %v2440_v47 = vld [vmem:[%s3311_s4 + $0x18] sm:$0xff] }
  0xfc   :  { %597 = vmatpush.msra.mxu1 %v1982_v58  ;;  %567 = vmatpush.msrb.mxu2 %v2004_v44  ;;  %3424 = vst [vmem:[#allocation27_spill] sm:$0xff] %v2440_v47 }
  0xfe   :  { %598 = vmatpush.msra.mxu1 %v1999_v62  ;;  %568 = vmatpush.msrb.mxu2 %v2022_v2 }
 0x100   :  { %599 = vmatpush.msra.mxu1 %v2017_v1  ;;  %569 = vmatpush.msrb.mxu2 %v2040_v6 }
 0x102   :  { %600 = vmatpush.msra.mxu1 %v2035_v5  ;;  %570 = vmatpush.msrb.mxu2 %v2058_v10 }
 0x104   :  { %601 = vmatpush.msra.mxu1 %v2053_v9  ;;  %571 = vmatpush.msrb.mxu2 %v2145_v41 }
 0x106   :  { %602 = vmatpush.msra.mxu1 %v2071_v13  ;;  %572 = vmatpush.msrb.mxu2 %v2156_v45 }
 0x108   :  { %603 = vmatpush.msra.mxu1 %v2084_v16  ;;  %664 = vmatpush.msra.mxu2 %v1847_v21 }
 0x10a   :  { %604 = vmatpush.msra.mxu1 %v2151_v42  ;;  %665 = vmatpush.msra.mxu2 %v1855_v23 }
 0x10c   :  { %605 = vmatpush.msra.mxu1 %v2161_v46  ;;  %666 = vmatpush.msra.mxu2 %v1870_v27 }
 0x10e   :  { %606 = vmatpush.msra.mxu1 %v2169_v49  ;;  %667 = vmatpush.msra.mxu2 %v1885_v31 }
 0x110   :  { %607 = vmatpush.msra.mxu1 %v2176_v50  ;;  %668 = vmatpush.msra.mxu2 %v1900_v35 }
 0x112   :  { %608 = vmatpush.msra.mxu1 %v2183_v51  ;;  %669 = vmatpush.msra.mxu2 %v1915_v39 }
 0x114   :  { %609 = vmatpush.msra.mxu1 %v2190_v53  ;;  %670 = vmatpush.msra.mxu2 %v1930_v43 }
 0x116   :  { %610 = vmatpush.msra.mxu1 %v2197_v54  ;;  %671 = vmatpush.msra.mxu2 %v1945_v48 }
 0x118   :  { %v81_v61 = vpop.f32.mrf.mxu1  ;;  %611 = vmatpush.msra.mxu1 %v2204_v55  ;;  %672 = vmatpush.msra.mxu2 %v1960_v52 }
 0x119   :  { %258 = vmatmul.f32.vlgmr.msra.gmra.mxu3 %v81_v61  ;;  %298 = vmatmul.f32.vlgmr.msrb.gmra.mxu0 %v81_v61 }
 0x11a   :  { %466 = vmatpush.msra.mxu3 %v2231_v57  ;;  %506 = vmatpush.msrb.mxu0 %v2236_v60 }
 0x11b   :  { %612 = vmatpush.msra.mxu1 %v2211_v56  ;;  %673 = vmatpush.msra.mxu2 %v1987_v59  ;;  %v3425_v59 = vmov 0.0  }
 0x11c   :  { %467 = vmatpush.msra.mxu3 %v2243_v63  ;;  %507 = vmatpush.msrb.mxu0 %v2248_v0 }
 0x11d   :  { %704 = vmatpush.msrb.mxu1 %v1982_v58  ;;  %674 = vmatpush.msra.mxu2 %v2004_v44 }
 0x11e   :  { %468 = vmatpush.msra.mxu3 %v2255_v3  ;;  %508 = vmatpush.msrb.mxu0 %v2260_v4 }
 0x11f   :  { %705 = vmatpush.msrb.mxu1 %v1999_v62  ;;  %675 = vmatpush.msra.mxu2 %v2022_v2 }
 0x120   :  { %469 = vmatpush.msra.mxu3 %v2269_v7  ;;  %509 = vmatpush.msrb.mxu0 %v2274_v8 }
 0x121   :  { %338 = vmatmul.f32.vlgmr.msrb.gmra.mxu3 %v81_v61  ;;  %378 = vmatmul.f32.vlgmr.msra.gmra.mxu0 %v81_v61  ;;  %v2435_v61 = vld [vmem:[%s3311_s4 + $0x8] sm:$0xff] }
 0x122   :  { %470 = vmatpush.msra.mxu3 %v2283_v11  ;;  %510 = vmatpush.msrb.mxu0 %v2288_v12  ;;  %3423 = vst [vmem:[#allocation26_spill] sm:$0xff] %v2435_v61 }
 0x123   :  { %706 = vmatpush.msrb.mxu1 %v2017_v1  ;;  %676 = vmatpush.msra.mxu2 %v2040_v6 }
 0x124   :  { %471 = vmatpush.msra.mxu3 %v2297_v14  ;;  %511 = vmatpush.msrb.mxu0 %v2302_v15 }
 0x125   :  { %707 = vmatpush.msrb.mxu1 %v2035_v5  ;;  %677 = vmatpush.msra.mxu2 %v2058_v10 }
 0x126   :  { %472 = vmatpush.msra.mxu3 %v2309_v17  ;;  %512 = vmatpush.msrb.mxu0 %v2314_v18 }
 0x127   :  { %708 = vmatpush.msrb.mxu1 %v2053_v9  ;;  %678 = vmatpush.msra.mxu2 %v2145_v41 }
 0x128   :  { %473 = vmatpush.msra.mxu3 %v2323_v19  ;;  %513 = vmatpush.msrb.mxu0 %v2328_v20 }
 0x129   :  { %709 = vmatpush.msrb.mxu1 %v2071_v13  ;;  %679 = vmatpush.msra.mxu2 %v2156_v45 }
 0x12a   :  { %474 = vmatpush.msra.mxu3 %v2337_v22  ;;  %514 = vmatpush.msrb.mxu0 %v2342_v24 }
 0x12b   :  { %710 = vmatpush.msrb.mxu1 %v2084_v16 }
 0x12c   :  { %475 = vmatpush.msra.mxu3 %v2351_v25  ;;  %515 = vmatpush.msrb.mxu0 %v2356_v26 }
 0x12d   :  { %711 = vmatpush.msrb.mxu1 %v2151_v42 }
 0x12e   :  { %476 = vmatpush.msra.mxu3 %v2365_v28  ;;  %516 = vmatpush.msrb.mxu0 %v2370_v29 }
 0x12f   :  { %712 = vmatpush.msrb.mxu1 %v2161_v46 }
 0x130   :  { %477 = vmatpush.msra.mxu3 %v2379_v30  ;;  %517 = vmatpush.msrb.mxu0 %v2384_v32 }
 0x131   :  { %713 = vmatpush.msrb.mxu1 %v2169_v49 }
 0x132   :  { %478 = vmatpush.msra.mxu3 %v2393_v33  ;;  %518 = vmatpush.msrb.mxu0 %v2398_v34 }
 0x133   :  { %714 = vmatpush.msrb.mxu1 %v2176_v50 }
 0x134   :  { %479 = vmatpush.msra.mxu3 %v2407_v36  ;;  %519 = vmatpush.msrb.mxu0 %v2412_v37 }
 0x135   :  { %715 = vmatpush.msrb.mxu1 %v2183_v51 }
 0x136   :  { %480 = vmatpush.msra.mxu3 %v2421_v38  ;;  %520 = vmatpush.msrb.mxu0 %v2426_v40 }
 0x137   :  { %716 = vmatpush.msrb.mxu1 %v2190_v53 }
 0x138   :  { %481 = vmatpush.msra.mxu3 %v2435_v61  ;;  %521 = vmatpush.msrb.mxu0 %v2440_v47 }
 0x139   :  { %482 = vmatmul.f32.vlgmr.msra.gmra.mxu3 %v3425_v59  ;;  %522 = vmatmul.f32.vlgmr.msrb.gmra.mxu0 %v3425_v59  ;;  %v239_v59 = vpop.f32.mrf.mxu2 }
 0x13a   :  { %577 = vmatpush.msrb.mxu3 %v2231_v57  ;;  %617 = vmatpush.msra.mxu0 %v2236_v60 }
 0x13b   :  { %717 = vmatpush.msrb.mxu1 %v2197_v54 }
 0x13c   :  { %578 = vmatpush.msrb.mxu3 %v2243_v63  ;;  %618 = vmatpush.msra.mxu0 %v2248_v0 }
 0x13d   :  { %718 = vmatpush.msrb.mxu1 %v2204_v55 }
 0x13e   :  { %579 = vmatpush.msrb.mxu3 %v2255_v3  ;;  %619 = vmatpush.msra.mxu0 %v2260_v4 }
 0x13f   :  { %719 = vmatpush.msrb.mxu1 %v2211_v56  ;;  %v212_v56 = vld [vmem:[%s3312_s3] sm:$0xf] }
 0x140   :  { %580 = vmatpush.msrb.mxu3 %v2269_v7  ;;  %620 = vmatpush.msra.mxu0 %v2274_v8  ;;  %v214_v41 = vperm.slane %v212_v56, 0  ;;  %v216_v53 = vperm.slane %v212_v56, 2  ;;  %v217_v6 = vperm.slane %v212_v56, 3 }
 0x141   :  { %v319_v45 = vpop.f32.mrf.mxu2 }
 0x142   :  { %581 = vmatpush.msrb.mxu3 %v2283_v11  ;;  %621 = vmatpush.msra.mxu0 %v2288_v12  ;;  %v240_v10 = vadd.f32 %v239_v59, %v214_v41 }
 0x144   :  { %582 = vmatpush.msrb.mxu3 %v2297_v14  ;;  %622 = vmatpush.msra.mxu0 %v2302_v15 }
 0x146   :  { %583 = vmatpush.msrb.mxu3 %v2309_v17  ;;  %623 = vmatpush.msra.mxu0 %v2314_v18 }
 0x148   :  { %584 = vmatpush.msrb.mxu3 %v2323_v19  ;;  %624 = vmatpush.msra.mxu0 %v2328_v20 }
 0x14a   :  { %585 = vmatpush.msrb.mxu3 %v2337_v22  ;;  %625 = vmatpush.msra.mxu0 %v2342_v24 }
 0x14c   :  { %586 = vmatpush.msrb.mxu3 %v2351_v25  ;;  %626 = vmatpush.msra.mxu0 %v2356_v26 }
 0x14e   :  { %587 = vmatpush.msrb.mxu3 %v2365_v28  ;;  %627 = vmatpush.msra.mxu0 %v2370_v29 }
 0x150   :  { %588 = vmatpush.msrb.mxu3 %v2379_v30  ;;  %628 = vmatpush.msra.mxu0 %v2384_v32 }
 0x152   :  { %589 = vmatpush.msrb.mxu3 %v2393_v33  ;;  %629 = vmatpush.msra.mxu0 %v2398_v34 }
 0x154   :  { %590 = vmatpush.msrb.mxu3 %v2407_v36  ;;  %630 = vmatpush.msra.mxu0 %v2412_v37 }
 0x156   :  { %591 = vmatpush.msrb.mxu3 %v2421_v38  ;;  %631 = vmatpush.msra.mxu0 %v2426_v40 }
 0x158   :  { %592 = vmatpush.msrb.mxu3 %v2435_v61  ;;  %632 = vmatpush.msra.mxu0 %v2440_v47 }
 0x15a   :  { %684 = vmatpush.msra.mxu3 %v2231_v57  ;;  %724 = vmatpush.msrb.mxu0 %v2236_v60 }
 0x15c   :  { %685 = vmatpush.msra.mxu3 %v2243_v63  ;;  %725 = vmatpush.msrb.mxu0 %v2248_v0 }
 0x15e   :  { %686 = vmatpush.msra.mxu3 %v2255_v3  ;;  %726 = vmatpush.msrb.mxu0 %v2260_v4 }
 0x160   :  { %687 = vmatpush.msra.mxu3 %v2269_v7  ;;  %727 = vmatpush.msrb.mxu0 %v2274_v8 }
 0x162   :  { %688 = vmatpush.msra.mxu3 %v2283_v11  ;;  %728 = vmatpush.msrb.mxu0 %v2288_v12 }
 0x164   :  { %689 = vmatpush.msra.mxu3 %v2297_v14  ;;  %729 = vmatpush.msrb.mxu0 %v2302_v15 }
 0x166   :  { %690 = vmatpush.msra.mxu3 %v2309_v17  ;;  %730 = vmatpush.msrb.mxu0 %v2314_v18 }
 0x168   :  { %691 = vmatpush.msra.mxu3 %v2323_v19  ;;  %731 = vmatpush.msrb.mxu0 %v2328_v20 }
 0x16a   :  { %692 = vmatpush.msra.mxu3 %v2337_v22  ;;  %732 = vmatpush.msrb.mxu0 %v2342_v24 }
 0x16c   :  { %693 = vmatpush.msra.mxu3 %v2351_v25  ;;  %733 = vmatpush.msrb.mxu0 %v2356_v26 }
 0x16e   :  { %694 = vmatpush.msra.mxu3 %v2365_v28  ;;  %734 = vmatpush.msrb.mxu0 %v2370_v29 }
 0x170   :  { %695 = vmatpush.msra.mxu3 %v2379_v30  ;;  %735 = vmatpush.msrb.mxu0 %v2384_v32  ;;  %v320_v32 = vadd.f32 %v319_v45, %v216_v53 }
 0x172   :  { %696 = vmatpush.msra.mxu3 %v2393_v33  ;;  %736 = vmatpush.msrb.mxu0 %v2398_v34 }
 0x174   :  { %697 = vmatpush.msra.mxu3 %v2407_v36  ;;  %737 = vmatpush.msrb.mxu0 %v2412_v37  ;;  %v279_v36 = vpop.f32.mrf.mxu1 }
 0x176   :  { %698 = vmatpush.msra.mxu3 %v2421_v38  ;;  %738 = vmatpush.msrb.mxu0 %v2426_v40  ;;  %v463_v38 = vpop.f32.mrf.mxu2 }
 0x178   :  { %699 = vmatpush.msra.mxu3 %v2435_v61  ;;  %739 = vmatpush.msrb.mxu0 %v2440_v47  ;;  %v215_v61 = vperm.slane %v212_v56, 1 }
 0x17a   :  { %v280_v51 = vadd.f32 %v279_v36, %v215_v61 }
 0x17c   :  { %v359_v34 = vpop.f32.mrf.mxu1 }
 0x17d   :  { %v360_v50 = vadd.f32 %v359_v34, %v217_v6 }
 0x184   :  { %v503_v41 = vpop.f32.mrf.mxu1 }
 0x196   :  { %v299_v54 = vpop.f32.mrf.mxu0 }
 0x197   :  { %v2538_v2 = vadd.f32 %v299_v54, %v280_v51 }
 0x199   :  { %3427 = vst [vmem:[#allocation29_spill] sm:$0xff] %v2538_v2 }
 0x19c   :  { %v259_v55 = vpop.f32.mrf.mxu3 }
 0x19d   :  { %v2535_v37 = vadd.f32 %v259_v55, %v240_v10 }
 0x19e   :  { %v379_v33 = vpop.f32.mrf.mxu0 }
 0x19f   :  { %3426 = vst [vmem:[#allocation28_spill] sm:$0xff] %v2535_v37  ;;  %v464_v47 = vadd.f32 %v463_v38, %v2535_v37  ;;  %v2543_v28 = vadd.f32 %v379_v33, %v360_v50 }
 0x1a1   :  { %v526_v30 = vmul.f32 0.5, %v464_v47  ;;  %3429 = vst [vmem:[#allocation31_spill] sm:$0xff] %v2543_v28 }
 0x1a3   :  { %1409 = vtanh.f32 %v526_v30 }
 0x1a4   :  { %v339_v40 = vpop.f32.mrf.mxu3 }
 0x1a5   :  { %v2540_v29 = vadd.f32 %v339_v40, %v320_v32 }
 0x1a7   :  { %3428 = vst [vmem:[#allocation30_spill] sm:$0xff] %v2540_v29  ;;  %v504_v44 = vadd.f32 %v503_v41, %v2540_v29 }
 0x1a9   :  { %v1410_v47 = vpop.eup %1409 }
 0x1aa   :  { %v528_v53 = vadd.f32 1.0, %v1410_v47  ;;  %v3444_v47 = vld [vmem:[#allocation22_spill] sm:$0xff] }
 0x1ac   :  { %v529_v30 = vmul.f32 0.5, %v528_v53  ;;  %v3446_v53 = vld [vmem:[#allocation23_spill] sm:$0xff] }
 0x1b6   :  { %v523_v55 = vpop.f32.mrf.mxu0 }
 0x1b7   :  { %v524_v45 = vadd.f32 %v523_v55, %v2543_v28  ;;  %v3440_v55 = vld [vmem:[#allocation20_spill] sm:$0xff] }
 0x1b9   :  { %v535_v51 = vmul.f32 0.5, %v524_v45  ;;  %v3443_v45 = vld [vmem:[#allocation7_spill] sm:$0xff] }
 0x1bc   :  { %v483_v10 = vpop.f32.mrf.mxu3 }
 0x1bd   :  { %v484_v59 = vadd.f32 %v483_v10, %v2538_v2 }
 0x1bf   :  { %v530_v38 = vmul.f32 0.5, %v484_v59  ;;  %v3441_v59 = vld [vmem:[#allocation12_spill] sm:$0xff] }
 0x1c1   :  { %1411 = vtanh.f32 %v530_v38  ;;  %v3442_v38 = vld [vmem:[#allocation21_spill] sm:$0xff] }
 0x1c2   :  { %1413 = vtanh.f32 %v504_v44  ;;  %v3439_v44 = vld [vmem:[#allocation6_spill] sm:$0xff] }
 0x1c3   :  { %1415 = vtanh.f32 %v535_v51  ;;  %v3445_v51 = vld [vmem:[#allocation13_spill] sm:$0xff] }
 0x1c7   :  { %v1412_v54 = vpop.eup %1411 }
 0x1c8   :  { %v532_v6 = vadd.f32 1.0, %v1412_v54  ;;  %v1414_v56 = vpop.eup %1413  ;;  %v3447_v54 = vld [vmem:[#allocation8_spill] sm:$0xff] }
 0x1c9   :  { %v540_v34 = vmul.f32 %v1414_v56, %v529_v30  ;;  %v1416_v50 = vpop.eup %1415  ;;  %v3449_v56 = vld [vmem:[#allocation14_spill] sm:$0xff]  ;;  %v3450_v30 = vld [vmem:[#allocation25_spill] sm:$0xff] }
 0x1ca   :  { %v533_v32 = vmul.f32 0.5, %v532_v6  ;;  %v537_v40 = vadd.f32 1.0, %v1416_v50  ;;  %v3448_v6 = vld [vmem:[#allocation24_spill] sm:$0xff]  ;;  %v3454_v50 = vld [vmem:[#allocation27_spill] sm:$0xff] }
 0x1cc   :  { %v539_v36 = vmul.f32 0.0, %v533_v32  ;;  %v538_v61 = vmul.f32 0.5, %v537_v40  ;;  %v3451_v32 = vld [vmem:[#allocation9_spill] sm:$0xff]  ;;  %v549_v40 = vrot.slane %v2535_v37, 1 }
 0x1ce   :  { %v2547_v33 = vadd.f32 %v540_v34, %v539_v36  ;;  %v3452_v34 = vld [vmem:[#allocation26_spill] sm:$0xff]  ;;  %v3453_v36 = vld [vmem:[#allocation15_spill] sm:$0xff] }
 0x1d0   :  { %1417 = vtanh.f32 %v2547_v33 }
 0x1d6   :  { %v1418_v41 = vpop.eup %1417 }
 0x1d7   :  { %v543_v10 = vmul.f32 %v1418_v41, %v538_v61  ;;  %v550_v61 = vrot.slane %v2538_v2, 1 }
 0x1d9   :  { %544 = vst [vmem:[#allocation2] sm:$0x1] %v543_v10  ;;  %573 = vmatmul.f32.vlgmr.msrb.gmra.mxu2 %v543_v10  ;;  %593 = vmatmul.f32.vlgmr.msrb.gmra.mxu3 %v543_v10 }
 0x1da   :  { %613 = vmatmul.f32.vlgmr.msra.gmra.mxu1 %v543_v10  ;;  %633 = vmatmul.f32.vlgmr.msra.gmra.mxu0 %v543_v10 }
 0x1db   :  { %771 = vmatpush.msrb.mxu2 %v1847_v21  ;;  %791 = vmatpush.msrb.mxu3 %v2231_v57  ;;  %v3430_v21 = vld [vmem:[#allocation3_spill] sm:$0xff] }
 0x1dc   :  { %811 = vmatpush.msra.mxu1 %v1982_v58  ;;  %831 = vmatpush.msra.mxu0 %v2236_v60 }
 0x1dd   :  { %772 = vmatpush.msrb.mxu2 %v1855_v23  ;;  %792 = vmatpush.msrb.mxu3 %v2243_v63  ;;  %v3431_v23 = vld [vmem:[#allocation4_spill] sm:$0xff] }
 0x1de   :  { %812 = vmatpush.msra.mxu1 %v1999_v62  ;;  %832 = vmatpush.msra.mxu0 %v2248_v0 }
 0x1df   :  { %773 = vmatpush.msrb.mxu2 %v1870_v27  ;;  %793 = vmatpush.msrb.mxu3 %v2255_v3  ;;  %v3432_v27 = vld [vmem:[#allocation16_spill] sm:$0xff] }
 0x1e0   :  { %813 = vmatpush.msra.mxu1 %v2017_v1  ;;  %833 = vmatpush.msra.mxu0 %v2260_v4 }
 0x1e1   :  { %774 = vmatpush.msrb.mxu2 %v1885_v31  ;;  %794 = vmatpush.msrb.mxu3 %v2269_v7  ;;  %v3433_v31 = vld [vmem:[#allocation10_spill] sm:$0xff] }
 0x1e2   :  { %814 = vmatpush.msra.mxu1 %v2035_v5  ;;  %834 = vmatpush.msra.mxu0 %v2274_v8 }
 0x1e3   :  { %775 = vmatpush.msrb.mxu2 %v1900_v35  ;;  %795 = vmatpush.msrb.mxu3 %v2283_v11  ;;  %v3434_v35 = vld [vmem:[#allocation17_spill] sm:$0xff] }
 0x1e4   :  { %815 = vmatpush.msra.mxu1 %v2053_v9  ;;  %835 = vmatpush.msra.mxu0 %v2288_v12 }
 0x1e5   :  { %776 = vmatpush.msrb.mxu2 %v1915_v39  ;;  %796 = vmatpush.msrb.mxu3 %v2297_v14  ;;  %v3435_v39 = vld [vmem:[#allocation5_spill] sm:$0xff] }
 0x1e6   :  { %816 = vmatpush.msra.mxu1 %v2071_v13  ;;  %836 = vmatpush.msra.mxu0 %v2302_v15 }
 0x1e7   :  { %777 = vmatpush.msrb.mxu2 %v1930_v43  ;;  %797 = vmatpush.msrb.mxu3 %v2309_v17  ;;  %v3436_v43 = vld [vmem:[#allocation18_spill] sm:$0xff] }
 0x1e8   :  { %817 = vmatpush.msra.mxu1 %v2084_v16  ;;  %837 = vmatpush.msra.mxu0 %v2314_v18 }
 0x1e9   :  { %778 = vmatpush.msrb.mxu2 %v1945_v48  ;;  %798 = vmatpush.msrb.mxu3 %v2323_v19  ;;  %v3437_v48 = vld [vmem:[#allocation11_spill] sm:$0xff] }
 0x1ea   :  { %818 = vmatpush.msra.mxu1 %v2151_v42  ;;  %838 = vmatpush.msra.mxu0 %v2328_v20 }
 0x1eb   :  { %779 = vmatpush.msrb.mxu2 %v1960_v52  ;;  %799 = vmatpush.msrb.mxu3 %v2337_v22  ;;  %v3438_v52 = vld [vmem:[#allocation19_spill] sm:$0xff] }
 0x1ec   :  { %819 = vmatpush.msra.mxu1 %v2161_v46  ;;  %839 = vmatpush.msra.mxu0 %v2342_v24 }
 0x1ed   :  { %780 = vmatpush.msrb.mxu2 %v3430_v21  ;;  %800 = vmatpush.msrb.mxu3 %v2351_v25 }
 0x1ee   :  { %820 = vmatpush.msra.mxu1 %v2169_v49  ;;  %840 = vmatpush.msra.mxu0 %v2356_v26 }
 0x1ef   :  { %781 = vmatpush.msrb.mxu2 %v3431_v23  ;;  %801 = vmatpush.msrb.mxu3 %v3432_v27 }
 0x1f0   :  { %821 = vmatpush.msra.mxu1 %v3433_v31  ;;  %841 = vmatpush.msra.mxu0 %v3434_v35 }
 0x1f1   :  { %782 = vmatpush.msrb.mxu2 %v3435_v39  ;;  %802 = vmatpush.msrb.mxu3 %v3436_v43 }
 0x1f2   :  { %822 = vmatpush.msra.mxu1 %v3437_v48  ;;  %842 = vmatpush.msra.mxu0 %v3438_v52 }
 0x1f3   :  { %783 = vmatpush.msrb.mxu2 %v3439_v44  ;;  %803 = vmatpush.msrb.mxu3 %v3440_v55 }
 0x1f4   :  { %823 = vmatpush.msra.mxu1 %v3441_v59  ;;  %843 = vmatpush.msra.mxu0 %v3442_v38 }
 0x1f5   :  { %784 = vmatpush.msrb.mxu2 %v3443_v45  ;;  %804 = vmatpush.msrb.mxu3 %v3444_v47 }
 0x1f6   :  { %824 = vmatpush.msra.mxu1 %v3445_v51  ;;  %844 = vmatpush.msra.mxu0 %v3446_v53 }
 0x1f7   :  { %785 = vmatpush.msrb.mxu2 %v3447_v54  ;;  %805 = vmatpush.msrb.mxu3 %v3448_v6 }
 0x1f8   :  { %825 = vmatpush.msra.mxu1 %v3449_v56  ;;  %845 = vmatpush.msra.mxu0 %v3450_v30  ;;  %v551_v30 = vrot.slane %v2540_v29, 1 }
 0x1f9   :  { %786 = vmatpush.msrb.mxu2 %v3451_v32  ;;  %806 = vmatpush.msrb.mxu3 %v3452_v34  ;;  %v552_v32 = vrot.slane %v2543_v28, 1 }
 0x1fa   :  { %826 = vmatpush.msra.mxu1 %v3453_v36  ;;  %846 = vmatpush.msra.mxu0 %v3454_v50 }
 0x257   :  { %v614_v53 = vpop.f32.mrf.mxu1  ;;  %v634_v56 = vpop.f32.mrf.mxu0 }
 0x258   :  { %v615_v47 = vadd.f32 %v614_v53, %v551_v30  ;;  %v635_v36 = vadd.f32 %v634_v56, %v552_v32  ;;  %v3469_v56 = vld [vmem:[#allocation29_spill] sm:$0xff] }
 0x259   :  { %v657_v30 = vrot.slane %v3469_v56, 2 }
 0x25a   :  { %v646_v37 = vmul.f32 0.5, %v635_v36 }
 0x25c   :  { %v574_v41 = vpop.f32.mrf.mxu2  ;;  %v594_v10 = vpop.f32.mrf.mxu3 }
 0x25d   :  { %v575_v54 = vadd.f32 %v574_v41, %v549_v40  ;;  %v595_v6 = vadd.f32 %v594_v10, %v550_v61 }
 0x25f   :  { %v637_v51 = vmul.f32 0.5, %v575_v54  ;;  %v641_v34 = vmul.f32 0.5, %v595_v6 }
 0x261   :  { %1419 = vtanh.f32 %v637_v51 }
 0x262   :  { %1421 = vtanh.f32 %v641_v34 }
 0x263   :  { %1423 = vtanh.f32 %v615_v47 }
 0x264   :  { %1425 = vtanh.f32 %v646_v37  ;;  %v3459_v37 = vld [vmem:[#allocation23_spill] sm:$0xff] }
 0x267   :  { %v1420_v50 = vpop.eup %1419 }
 0x268   :  { %v1422_v2 = vpop.eup %1421  ;;  %v639_v45 = vadd.f32 1.0, %v1420_v50 }
 0x269   :  { %v643_v40 = vadd.f32 1.0, %v1422_v2  ;;  %v1424_v41 = vpop.eup %1423  ;;  %v2625_v2 = vld [vmem:[%s3311_s4 + $0x1e0] sm:$0xff] }
 0x26a   :  { %v640_v61 = vmul.f32 0.5, %v639_v45  ;;  %v1426_v28 = vpop.eup %1425 }
 0x26b   :  { %v644_v10 = vmul.f32 0.5, %v643_v40  ;;  %v648_v51 = vadd.f32 1.0, %v1426_v28  ;;  %v2634_v28 = vld [vmem:[%s3311_s4 + $0x1c0] sm:$0xff] }
 0x26c   :  { %v651_v38 = vmul.f32 %v1424_v41, %v640_v61  ;;  %v3470_v41 = vld [vmem:[#allocation30_spill] sm:$0xff] }
 0x26d   :  { %v650_v29 = vmul.f32 %v644_v10, %v2547_v33  ;;  %v649_v53 = vmul.f32 0.5, %v648_v51  ;;  %v3460_v33 = vld [vmem:[#allocation8_spill] sm:$0xff]  ;;  %v658_v10 = vrot.slane %v3470_v41, 2  ;;  %v3471_v51 = vld [vmem:[#allocation31_spill] sm:$0xff] }
 0x26f   :  { %v2619_v54 = vadd.f32 %v651_v38, %v650_v29  ;;  %v2643_v29 = vld [vmem:[%s3311_s4 + $0x1a0] sm:$0xff]  ;;  %v3468_v38 = vld [vmem:[#allocation28_spill] sm:$0xff] }
 0x270   :  { %v656_v45 = vrot.slane %v3468_v38, 2 }
 0x271   :  { %1427 = vtanh.f32 %v2619_v54 }
 0x277   :  { %v1428_v47 = vpop.eup %1427 }
 0x278   :  { %v654_v6 = vmul.f32 %v1428_v47, %v649_v53  ;;  %v659_v53 = vrot.slane %v3471_v51, 2 }
 0x27a   :  { %655 = vst [vmem:[#allocation2 + $0x1] sm:$0x1] %v654_v6  ;;  %680 = vmatmul.f32.vlgmr.msra.gmra.mxu2 %v654_v6  ;;  %700 = vmatmul.f32.vlgmr.msra.gmra.mxu3 %v654_v6 }
 0x27b   :  { %720 = vmatmul.f32.vlgmr.msrb.gmra.mxu1 %v654_v6  ;;  %740 = vmatmul.f32.vlgmr.msrb.gmra.mxu0 %v654_v6 }
 0x27c   :  { %878 = vmatpush.msra.mxu2 %v2625_v2  ;;  %898 = vmatpush.msra.mxu3 %v2231_v57 }
 0x27d   :  { %918 = vmatpush.msrb.mxu1 %v1982_v58  ;;  %938 = vmatpush.msrb.mxu0 %v2236_v60  ;;  %v2652_v58 = vld [vmem:[%s3311_s4 + $0x180] sm:$0xff] }
 0x27e   :  { %879 = vmatpush.msra.mxu2 %v2634_v28  ;;  %899 = vmatpush.msra.mxu3 %v2243_v63 }
 0x27f   :  { %919 = vmatpush.msrb.mxu1 %v1999_v62  ;;  %939 = vmatpush.msrb.mxu0 %v2248_v0  ;;  %v2661_v62 = vld [vmem:[%s3311_s4 + $0x160] sm:$0xff] }
 0x280   :  { %880 = vmatpush.msra.mxu2 %v2643_v29  ;;  %900 = vmatpush.msra.mxu3 %v2255_v3 }
 0x281   :  { %920 = vmatpush.msrb.mxu1 %v2017_v1  ;;  %940 = vmatpush.msrb.mxu0 %v2260_v4  ;;  %v2670_v1 = vld [vmem:[%s3311_s4 + $0x140] sm:$0xff] }
 0x282   :  { %881 = vmatpush.msra.mxu2 %v2652_v58  ;;  %901 = vmatpush.msra.mxu3 %v2269_v7 }
 0x283   :  { %921 = vmatpush.msrb.mxu1 %v2035_v5  ;;  %941 = vmatpush.msrb.mxu0 %v2274_v8  ;;  %v2679_v5 = vld [vmem:[%s3311_s4 + $0x120] sm:$0xff] }
 0x284   :  { %882 = vmatpush.msra.mxu2 %v2661_v62  ;;  %902 = vmatpush.msra.mxu3 %v2283_v11 }
 0x285   :  { %922 = vmatpush.msrb.mxu1 %v2053_v9  ;;  %942 = vmatpush.msrb.mxu0 %v2288_v12  ;;  %v2688_v9 = vld [vmem:[%s3311_s4 + $0x100] sm:$0xff] }
 0x286   :  { %883 = vmatpush.msra.mxu2 %v2670_v1  ;;  %903 = vmatpush.msra.mxu3 %v2297_v14 }
 0x287   :  { %923 = vmatpush.msrb.mxu1 %v2071_v13  ;;  %943 = vmatpush.msrb.mxu0 %v2302_v15  ;;  %v2697_v13 = vld [vmem:[%s3311_s4 + $0xe0] sm:$0xff] }
 0x288   :  { %884 = vmatpush.msra.mxu2 %v2679_v5  ;;  %904 = vmatpush.msra.mxu3 %v2309_v17 }
 0x289   :  { %924 = vmatpush.msrb.mxu1 %v2084_v16  ;;  %944 = vmatpush.msrb.mxu0 %v2314_v18  ;;  %v3455_v16 = vld [vmem:[#allocation21_spill] sm:$0xff] }
 0x28a   :  { %885 = vmatpush.msra.mxu2 %v2688_v9  ;;  %905 = vmatpush.msra.mxu3 %v2323_v19 }
 0x28b   :  { %925 = vmatpush.msrb.mxu1 %v2151_v42  ;;  %945 = vmatpush.msrb.mxu0 %v2328_v20  ;;  %v3456_v42 = vld [vmem:[#allocation7_spill] sm:$0xff] }
 0x28c   :  { %886 = vmatpush.msra.mxu2 %v2697_v13  ;;  %906 = vmatpush.msra.mxu3 %v2337_v22 }
 0x28d   :  { %926 = vmatpush.msrb.mxu1 %v2161_v46  ;;  %946 = vmatpush.msrb.mxu0 %v2342_v24  ;;  %v3457_v46 = vld [vmem:[#allocation22_spill] sm:$0xff] }
 0x28e   :  { %887 = vmatpush.msra.mxu2 %v3430_v21  ;;  %907 = vmatpush.msra.mxu3 %v2351_v25  ;;  %v3461_v21 = vld [vmem:[#allocation24_spill] sm:$0xff] }
 0x28f   :  { %927 = vmatpush.msrb.mxu1 %v2169_v49  ;;  %947 = vmatpush.msrb.mxu0 %v2356_v26  ;;  %v3458_v49 = vld [vmem:[#allocation13_spill] sm:$0xff] }
 0x290   :  { %888 = vmatpush.msra.mxu2 %v3431_v23  ;;  %908 = vmatpush.msra.mxu3 %v3432_v27  ;;  %v3462_v23 = vld [vmem:[#allocation14_spill] sm:$0xff] }
 0x291   :  { %928 = vmatpush.msrb.mxu1 %v3433_v31  ;;  %948 = vmatpush.msrb.mxu0 %v3434_v35  ;;  %v3463_v31 = vld [vmem:[#allocation25_spill] sm:$0xff] }
 0x292   :  { %889 = vmatpush.msra.mxu2 %v3435_v39  ;;  %909 = vmatpush.msra.mxu3 %v3436_v43  ;;  %v3464_v39 = vld [vmem:[#allocation9_spill] sm:$0xff] }
 0x293   :  { %929 = vmatpush.msrb.mxu1 %v3437_v48  ;;  %949 = vmatpush.msrb.mxu0 %v3438_v52  ;;  %v3465_v48 = vld [vmem:[#allocation26_spill] sm:$0xff] }
 0x294   :  { %890 = vmatpush.msra.mxu2 %v3439_v44  ;;  %910 = vmatpush.msra.mxu3 %v3440_v55  ;;  %v3466_v44 = vld [vmem:[#allocation15_spill] sm:$0xff] }
 0x295   :  { %930 = vmatpush.msrb.mxu1 %v3441_v59  ;;  %950 = vmatpush.msrb.mxu0 %v3455_v16  ;;  %v3467_v59 = vld [vmem:[#allocation27_spill] sm:$0xff] }
 0x296   :  { %891 = vmatpush.msra.mxu2 %v3456_v42  ;;  %911 = vmatpush.msra.mxu3 %v3457_v46 }
 0x297   :  { %931 = vmatpush.msrb.mxu1 %v3458_v49  ;;  %951 = vmatpush.msrb.mxu0 %v3459_v37 }
 0x298   :  { %892 = vmatpush.msra.mxu2 %v3460_v33  ;;  %912 = vmatpush.msra.mxu3 %v3461_v21 }
 0x299   :  { %932 = vmatpush.msrb.mxu1 %v3462_v23  ;;  %952 = vmatpush.msrb.mxu0 %v3463_v31 }
 0x29a   :  { %893 = vmatpush.msra.mxu2 %v3464_v39  ;;  %913 = vmatpush.msra.mxu3 %v3465_v48 }
 0x29b   :  { %933 = vmatpush.msrb.mxu1 %v3466_v44  ;;  %953 = vmatpush.msrb.mxu0 %v3467_v59 }
 0x2f8   :  { %v721_v40 = vpop.f32.mrf.mxu1  ;;  %v741_v61 = vpop.f32.mrf.mxu0 }
 0x2f9   :  { %v722_v42 = vadd.f32 %v721_v40, %v658_v10  ;;  %v742_v49 = vadd.f32 %v741_v61, %v659_v53 }
 0x2fb   :  { %v753_v33 = vmul.f32 0.5, %v742_v49 }
 0x2fd   :  { %v681_v32 = vpop.f32.mrf.mxu2  ;;  %v701_v34 = vpop.f32.mrf.mxu3 }
 0x2fe   :  { %v682_v36 = vadd.f32 %v681_v32, %v656_v45  ;;  %v702_v50 = vadd.f32 %v701_v34, %v657_v30 }
 0x300   :  { %v744_v47 = vmul.f32 0.5, %v682_v36  ;;  %v748_v6 = vmul.f32 0.5, %v702_v50 }
 0x302   :  { %1429 = vtanh.f32 %v744_v47 }
 0x303   :  { %1431 = vtanh.f32 %v748_v6 }
 0x304   :  { %1433 = vtanh.f32 %v722_v42 }
 0x305   :  { %1435 = vtanh.f32 %v753_v33 }
 0x308   :  { %v1430_v23 = vpop.eup %1429 }
 0x309   :  { %v1432_v39 = vpop.eup %1431  ;;  %v746_v44 = vadd.f32 1.0, %v1430_v23 }
 0x30a   :  { %v750_v45 = vadd.f32 1.0, %v1432_v39  ;;  %v1434_v32 = vpop.eup %1433 }
 0x30b   :  { %v747_v30 = vmul.f32 0.5, %v746_v44  ;;  %v1436_v51 = vpop.eup %1435 }
 0x30c   :  { %v751_v34 = vmul.f32 0.5, %v750_v45  ;;  %v755_v50 = vadd.f32 1.0, %v1436_v51  ;;  %v3485_v51 = vld [vmem:[#allocation31_spill] sm:$0xff] }
 0x30d   :  { %v758_v56 = vmul.f32 %v1434_v32, %v747_v30  ;;  %v766_v53 = vrot.slane %v3485_v51, 3 }
 0x30e   :  { %v757_v41 = vmul.f32 %v751_v34, %v2619_v54  ;;  %v756_v40 = vmul.f32 0.5, %v755_v50  ;;  %v2744_v54 = vld [vmem:[%s3311_s4 + $0x1f0] sm:$0xff] }
 0x310   :  { %v2736_v36 = vadd.f32 %v758_v56, %v757_v41  ;;  %v2753_v56 = vld [vmem:[%s3311_s4 + $0x1d0] sm:$0xff] }
 0x312   :  { %1437 = vtanh.f32 %v2736_v36 }
 0x318   :  { %v1438_v61 = vpop.eup %1437 }
 0x319   :  { %v761_v10 = vmul.f32 %v1438_v61, %v756_v40 }
 0x31b   :  { %762 = vst [vmem:[#allocation2 + $0x2] sm:$0x1] %v761_v10  ;;  %787 = vmatmul.f32.vlgmr.msrb.gmra.mxu2 %v761_v10  ;;  %807 = vmatmul.f32.vlgmr.msrb.gmra.mxu3 %v761_v10 }
 0x31c   :  { %827 = vmatmul.f32.vlgmr.msra.gmra.mxu1 %v761_v10  ;;  %847 = vmatmul.f32.vlgmr.msra.gmra.mxu0 %v761_v10 }
 0x31d   :  { %985 = vmatpush.msrb.mxu2 %v2625_v2  ;;  %1005 = vmatpush.msrb.mxu3 %v2231_v57  ;;  %v2762_v57 = vld [vmem:[%s3311_s4 + $0x1b0] sm:$0xff] }
 0x31e   :  { %1025 = vmatpush.msra.mxu1 %v2744_v54  ;;  %1045 = vmatpush.msra.mxu0 %v2236_v60  ;;  %v2771_v60 = vld [vmem:[%s3311_s4 + $0x190] sm:$0xff] }
 0x31f   :  { %986 = vmatpush.msrb.mxu2 %v2634_v28  ;;  %1006 = vmatpush.msrb.mxu3 %v2243_v63  ;;  %v2780_v63 = vld [vmem:[%s3311_s4 + $0x170] sm:$0xff] }
 0x320   :  { %1026 = vmatpush.msra.mxu1 %v2753_v56  ;;  %1046 = vmatpush.msra.mxu0 %v2248_v0  ;;  %v2789_v0 = vld [vmem:[%s3311_s4 + $0x150] sm:$0xff] }
 0x321   :  { %987 = vmatpush.msrb.mxu2 %v2643_v29  ;;  %1007 = vmatpush.msrb.mxu3 %v2255_v3  ;;  %v2798_v3 = vld [vmem:[%s3311_s4 + $0x130] sm:$0xff] }
 0x322   :  { %1027 = vmatpush.msra.mxu1 %v2762_v57  ;;  %1047 = vmatpush.msra.mxu0 %v2260_v4  ;;  %v2807_v4 = vld [vmem:[%s3311_s4 + $0x110] sm:$0xff] }
 0x323   :  { %988 = vmatpush.msrb.mxu2 %v2652_v58  ;;  %1008 = vmatpush.msrb.mxu3 %v2269_v7  ;;  %v2816_v7 = vld [vmem:[%s3311_s4 + $0xf0] sm:$0xff] }
 0x324   :  { %1028 = vmatpush.msra.mxu1 %v2771_v60  ;;  %1048 = vmatpush.msra.mxu0 %v2274_v8  ;;  %v2823_v8 = vld [vmem:[%s3311_s4 + $0xc0] sm:$0xff] }
 0x325   :  { %989 = vmatpush.msrb.mxu2 %v2661_v62  ;;  %1009 = vmatpush.msrb.mxu3 %v2283_v11  ;;  %v2830_v11 = vld [vmem:[%s3311_s4 + $0xd0] sm:$0xff] }
 0x326   :  { %1029 = vmatpush.msra.mxu1 %v2780_v63  ;;  %1049 = vmatpush.msra.mxu0 %v2288_v12  ;;  %v2837_v12 = vld [vmem:[%s3311_s4 + $0xa0] sm:$0xff] }
 0x327   :  { %990 = vmatpush.msrb.mxu2 %v2670_v1  ;;  %1010 = vmatpush.msrb.mxu3 %v2297_v14  ;;  %v2844_v14 = vld [vmem:[%s3311_s4 + $0xb0] sm:$0xff] }
 0x328   :  { %1030 = vmatpush.msra.mxu1 %v2789_v0  ;;  %1050 = vmatpush.msra.mxu0 %v2302_v15  ;;  %3472 = vst [vmem:[#allocation3_spill] sm:$0xff] %v2844_v14  ;;  %v2851_v15 = vld [vmem:[%s3311_s4 + $0x80] sm:$0xff] }
 0x329   :  { %991 = vmatpush.msrb.mxu2 %v2679_v5  ;;  %1011 = vmatpush.msrb.mxu3 %v2309_v17  ;;  %3473 = vst [vmem:[#allocation4_spill] sm:$0xff] %v2851_v15  ;;  %v2858_v17 = vld [vmem:[%s3311_s4 + $0x90] sm:$0xff] }
 0x32a   :  { %1031 = vmatpush.msra.mxu1 %v2798_v3  ;;  %1051 = vmatpush.msra.mxu0 %v2314_v18  ;;  %3474 = vst [vmem:[#allocation16_spill] sm:$0xff] %v2858_v17  ;;  %v2865_v18 = vld [vmem:[%s3311_s4 + $0x60] sm:$0xff] }
 0x32b   :  { %992 = vmatpush.msrb.mxu2 %v2688_v9  ;;  %1012 = vmatpush.msrb.mxu3 %v2323_v19  ;;  %3475 = vst [vmem:[#allocation10_spill] sm:$0xff] %v2865_v18  ;;  %v2872_v19 = vld [vmem:[%s3311_s4 + $0x70] sm:$0xff] }
 0x32c   :  { %1032 = vmatpush.msra.mxu1 %v2807_v4  ;;  %1052 = vmatpush.msra.mxu0 %v2328_v20  ;;  %3476 = vst [vmem:[#allocation17_spill] sm:$0xff] %v2872_v19  ;;  %v2879_v20 = vld [vmem:[%s3311_s4 + $0x40] sm:$0xff] }
 0x32d   :  { %993 = vmatpush.msrb.mxu2 %v2697_v13  ;;  %1013 = vmatpush.msrb.mxu3 %v2337_v22  ;;  %3477 = vst [vmem:[#allocation5_spill] sm:$0xff] %v2879_v20  ;;  %v2886_v22 = vld [vmem:[%s3311_s4 + $0x50] sm:$0xff] }
 0x32e   :  { %1033 = vmatpush.msra.mxu1 %v2816_v7  ;;  %1053 = vmatpush.msra.mxu0 %v2342_v24  ;;  %3478 = vst [vmem:[#allocation18_spill] sm:$0xff] %v2886_v22  ;;  %v2893_v24 = vld [vmem:[%s3311_s4 + $0x20] sm:$0xff] }
 0x32f   :  { %994 = vmatpush.msrb.mxu2 %v2823_v8  ;;  %1014 = vmatpush.msrb.mxu3 %v2351_v25  ;;  %3479 = vst [vmem:[#allocation11_spill] sm:$0xff] %v2893_v24  ;;  %v2900_v25 = vld [vmem:[%s3311_s4 + $0x30] sm:$0xff] }
 0x330   :  { %1034 = vmatpush.msra.mxu1 %v2830_v11  ;;  %1054 = vmatpush.msra.mxu0 %v2356_v26  ;;  %3480 = vst [vmem:[#allocation19_spill] sm:$0xff] %v2900_v25  ;;  %v2907_v26 = vld [vmem:[%s3311_s4] sm:$0xff] }
 0x331   :  { %995 = vmatpush.msrb.mxu2 %v2837_v12  ;;  %1015 = vmatpush.msrb.mxu3 %v3432_v27  ;;  %3481 = vst [vmem:[#allocation6_spill] sm:$0xff] %v2907_v26  ;;  %v2914_v27 = vld [vmem:[%s3311_s4 + $0x10] sm:$0xff] }
 0x332   :  { %1035 = vmatpush.msra.mxu1 %v2844_v14  ;;  %1055 = vmatpush.msra.mxu0 %v3434_v35  ;;  %3482 = vst [vmem:[#allocation20_spill] sm:$0xff] %v2914_v27  ;;  %v763_v35 = vrot.slane %v3468_v38, 3 }
 0x333   :  { %996 = vmatpush.msrb.mxu2 %v2851_v15  ;;  %1016 = vmatpush.msrb.mxu3 %v3436_v43  ;;  %v3483_v43 = vld [vmem:[#allocation29_spill] sm:$0xff] }
 0x334   :  { %1036 = vmatpush.msra.mxu1 %v2858_v17  ;;  %1056 = vmatpush.msra.mxu0 %v3438_v52  ;;  %v764_v52 = vrot.slane %v3483_v43, 3 }
 0x335   :  { %997 = vmatpush.msrb.mxu2 %v2865_v18  ;;  %1017 = vmatpush.msrb.mxu3 %v3440_v55 }
 0x336   :  { %1037 = vmatpush.msra.mxu1 %v2872_v19  ;;  %1057 = vmatpush.msra.mxu0 %v3455_v16 }
 0x337   :  { %998 = vmatpush.msrb.mxu2 %v2879_v20  ;;  %1018 = vmatpush.msrb.mxu3 %v3457_v46 }
 0x338   :  { %1038 = vmatpush.msra.mxu1 %v2886_v22  ;;  %1058 = vmatpush.msra.mxu0 %v3459_v37 }
 0x339   :  { %999 = vmatpush.msrb.mxu2 %v2893_v24  ;;  %1019 = vmatpush.msrb.mxu3 %v3461_v21 }
 0x33a   :  { %1039 = vmatpush.msra.mxu1 %v2900_v25  ;;  %1059 = vmatpush.msra.mxu0 %v3463_v31 }
 0x33b   :  { %1000 = vmatpush.msrb.mxu2 %v2907_v26  ;;  %1020 = vmatpush.msrb.mxu3 %v3465_v48  ;;  %v3484_v48 = vld [vmem:[#allocation30_spill] sm:$0xff] }
 0x33c   :  { %1040 = vmatpush.msra.mxu1 %v2914_v27  ;;  %1060 = vmatpush.msra.mxu0 %v3467_v59  ;;  %v765_v41 = vrot.slane %v3484_v48, 3 }
 0x399   :  { %v828_v21 = vpop.f32.mrf.mxu1  ;;  %v848_v31 = vpop.f32.mrf.mxu0 }
 0x39a   :  { %v829_v42 = vadd.f32 %v828_v21, %v765_v41  ;;  %v849_v49 = vadd.f32 %v848_v31, %v766_v53  ;;  %v2958_v21 = vld [vmem:[%s3311_s4 + $0x1a8] sm:$0xff]  ;;  %v2965_v31 = vld [vmem:[%s3311_s4 + $0x1b8] sm:$0xff] }
 0x39b   :  { %v2972_v41 = vld [vmem:[%s3311_s4 + $0x188] sm:$0xff]  ;;  %v2979_v53 = vld [vmem:[%s3311_s4 + $0x198] sm:$0xff] }
 0x39c   :  { %v860_v59 = vmul.f32 0.5, %v849_v49  ;;  %v3007_v49 = vld [vmem:[%s3311_s4 + $0x158] sm:$0xff] }
 0x39e   :  { %v788_v55 = vpop.f32.mrf.mxu2  ;;  %v808_v16 = vpop.f32.mrf.mxu3 }
 0x39f   :  { %v789_v46 = vadd.f32 %v788_v55, %v763_v35  ;;  %v809_v37 = vadd.f32 %v808_v16, %v764_v52  ;;  %v2937_v16 = vld [vmem:[%s3311_s4 + $0x1f8] sm:$0xff] }
 0x3a1   :  { %v851_v47 = vmul.f32 0.5, %v789_v46  ;;  %v855_v6 = vmul.f32 0.5, %v809_v37  ;;  %v2944_v46 = vld [vmem:[%s3311_s4 + $0x1c8] sm:$0xff]  ;;  %v2951_v37 = vld [vmem:[%s3311_s4 + $0x1d8] sm:$0xff] }
 0x3a3   :  { %1439 = vtanh.f32 %v851_v47  ;;  %v2986_v47 = vld [vmem:[%s3311_s4 + $0x168] sm:$0xff] }
 0x3a4   :  { %1441 = vtanh.f32 %v855_v6  ;;  %v2993_v6 = vld [vmem:[%s3311_s4 + $0x178] sm:$0xff] }
 0x3a5   :  { %1443 = vtanh.f32 %v829_v42  ;;  %v3000_v42 = vld [vmem:[%s3311_s4 + $0x148] sm:$0xff] }
 0x3a6   :  { %1445 = vtanh.f32 %v860_v59  ;;  %v3014_v59 = vld [vmem:[%s3311_s4 + $0x128] sm:$0xff] }
 0x3a9   :  { %v1440_v33 = vpop.eup %1439 }
 0x3aa   :  { %v1442_v23 = vpop.eup %1441  ;;  %v853_v39 = vadd.f32 1.0, %v1440_v33  ;;  %v3021_v33 = vld [vmem:[%s3311_s4 + $0x138] sm:$0xff] }
 0x3ab   :  { %v857_v44 = vadd.f32 1.0, %v1442_v23  ;;  %v1444_v30 = vpop.eup %1443  ;;  %v3028_v23 = vld [vmem:[%s3311_s4 + $0x108] sm:$0xff] }
 0x3ac   :  { %v854_v45 = vmul.f32 0.5, %v853_v39  ;;  %v1446_v40 = vpop.eup %1445  ;;  %v3035_v39 = vld [vmem:[%s3311_s4 + $0x118] sm:$0xff] }
 0x3ad   :  { %v858_v32 = vmul.f32 0.5, %v857_v44  ;;  %v862_v10 = vadd.f32 1.0, %v1446_v40  ;;  %v3042_v44 = vld [vmem:[%s3311_s4 + $0xe8] sm:$0xff] }
 0x3ae   :  { %v865_v34 = vmul.f32 %v1444_v30, %v854_v45  ;;  %v3049_v45 = vld [vmem:[%s3311_s4 + $0xf8] sm:$0xff]  ;;  %v3056_v30 = vld [vmem:[%s3311_s4 + $0xc8] sm:$0xff] }
 0x3af   :  { %v864_v50 = vmul.f32 %v858_v32, %v2736_v36  ;;  %v863_v35 = vmul.f32 0.5, %v862_v10  ;;  %v2930_v36 = vld [vmem:[%s3311_s4 + $0x1e8] sm:$0xff]  ;;  %v3063_v32 = vld [vmem:[%s3311_s4 + $0xd8] sm:$0xff] }
 0x3b0   :  { %v3084_v40 = vld [vmem:[%s3311_s4 + $0x88] sm:$0xff]  ;;  %v3091_v10 = vld [vmem:[%s3311_s4 + $0x98] sm:$0xff] }
 0x3b1   :  { %v2923_v61 = vadd.f32 %v865_v34, %v864_v50  ;;  %v3070_v34 = vld [vmem:[%s3311_s4 + $0xa8] sm:$0xff]  ;;  %v3077_v50 = vld [vmem:[%s3311_s4 + $0xb8] sm:$0xff]  ;;  %3487 = vst [vmem:[#allocation21_spill] sm:$0xff] %v3084_v40 }
 0x3b2   :  { %3486 = vst [vmem:[#allocation12_spill] sm:$0xff] %v3077_v50 }
 0x3b3   :  { %1447 = vtanh.f32 %v2923_v61  ;;  %3488 = vst [vmem:[#allocation7_spill] sm:$0xff] %v3091_v10 }
 0x3b9   :  { %v1448_v52 = vpop.eup %1447 }
 0x3ba   :  { %v868_v55 = vmul.f32 %v1448_v52, %v863_v35  ;;  %v3098_v35 = vld [vmem:[%s3311_s4 + $0x68] sm:$0xff]  ;;  %v3105_v52 = vld [vmem:[%s3311_s4 + $0x78] sm:$0xff] }
 0x3bb   :  { %3489 = vst [vmem:[#allocation22_spill] sm:$0xff] %v3098_v35 }
 0x3bc   :  { %869 = vst [vmem:[#allocation2 + $0x3] sm:$0x1] %v868_v55  ;;  %894 = vmatmul.f32.vlgmr.msra.gmra.mxu2 %v868_v55  ;;  %914 = vmatmul.f32.vlgmr.msra.gmra.mxu3 %v868_v55 }
 0x3bd   :  { %934 = vmatmul.f32.vlgmr.msrb.gmra.mxu1 %v868_v55  ;;  %954 = vmatmul.f32.vlgmr.msrb.gmra.mxu0 %v868_v55  ;;  %3490 = vst [vmem:[#allocation13_spill] sm:$0xff] %v3105_v52  ;;  %v3112_v55 = vld [vmem:[%s3311_s4 + $0x48] sm:$0xff] }
 0x3be   :  { %1092 = vmatpush.msra.mxu2 %v2625_v2  ;;  %1112 = vmatpush.msra.mxu3 %v2930_v36  ;;  %3491 = vst [vmem:[#allocation23_spill] sm:$0xff] %v3112_v55 }
 0x3bf   :  { %1132 = vmatpush.msrb.mxu1 %v2744_v54  ;;  %1152 = vmatpush.msrb.mxu0 %v2937_v16 }
 0x3c0   :  { %1093 = vmatpush.msra.mxu2 %v2634_v28  ;;  %1113 = vmatpush.msra.mxu3 %v2944_v46 }
 0x3c1   :  { %1133 = vmatpush.msrb.mxu1 %v2753_v56  ;;  %1153 = vmatpush.msrb.mxu0 %v2951_v37 }
 0x3c2   :  { %1094 = vmatpush.msra.mxu2 %v2643_v29  ;;  %1114 = vmatpush.msra.mxu3 %v2958_v21 }
 0x3c3   :  { %1134 = vmatpush.msrb.mxu1 %v2762_v57  ;;  %1154 = vmatpush.msrb.mxu0 %v2965_v31 }
 0x3c4   :  { %1095 = vmatpush.msra.mxu2 %v2652_v58  ;;  %1115 = vmatpush.msra.mxu3 %v2972_v41 }
 0x3c5   :  { %1135 = vmatpush.msrb.mxu1 %v2771_v60  ;;  %1155 = vmatpush.msrb.mxu0 %v2979_v53 }
 0x3c6   :  { %1096 = vmatpush.msra.mxu2 %v2661_v62  ;;  %1116 = vmatpush.msra.mxu3 %v2986_v47 }
 0x3c7   :  { %1136 = vmatpush.msrb.mxu1 %v2780_v63  ;;  %1156 = vmatpush.msrb.mxu0 %v2993_v6 }
 0x3c8   :  { %1097 = vmatpush.msra.mxu2 %v2670_v1  ;;  %1117 = vmatpush.msra.mxu3 %v3000_v42 }
 0x3c9   :  { %1137 = vmatpush.msrb.mxu1 %v2789_v0  ;;  %1157 = vmatpush.msrb.mxu0 %v3007_v49 }
 0x3ca   :  { %1098 = vmatpush.msra.mxu2 %v2679_v5  ;;  %1118 = vmatpush.msra.mxu3 %v3014_v59 }
 0x3cb   :  { %1138 = vmatpush.msrb.mxu1 %v2798_v3  ;;  %1158 = vmatpush.msrb.mxu0 %v3021_v33 }
 0x3cc   :  { %1099 = vmatpush.msra.mxu2 %v2688_v9  ;;  %1119 = vmatpush.msra.mxu3 %v3028_v23 }
 0x3cd   :  { %1139 = vmatpush.msrb.mxu1 %v2807_v4  ;;  %1159 = vmatpush.msrb.mxu0 %v3035_v39 }
 0x3ce   :  { %1100 = vmatpush.msra.mxu2 %v2697_v13  ;;  %1120 = vmatpush.msra.mxu3 %v3042_v44 }
 0x3cf   :  { %1140 = vmatpush.msrb.mxu1 %v2816_v7  ;;  %1160 = vmatpush.msrb.mxu0 %v3049_v45 }
 0x3d0   :  { %1101 = vmatpush.msra.mxu2 %v2823_v8  ;;  %1121 = vmatpush.msra.mxu3 %v3056_v30 }
 0x3d1   :  { %1141 = vmatpush.msrb.mxu1 %v2830_v11  ;;  %1161 = vmatpush.msrb.mxu0 %v3063_v32 }
 0x3d2   :  { %1102 = vmatpush.msra.mxu2 %v2837_v12  ;;  %1122 = vmatpush.msra.mxu3 %v3070_v34 }
 0x3d3   :  { %1142 = vmatpush.msrb.mxu1 %v2844_v14  ;;  %1162 = vmatpush.msrb.mxu0 %v3077_v50 }
 0x3d4   :  { %1103 = vmatpush.msra.mxu2 %v2851_v15  ;;  %1123 = vmatpush.msra.mxu3 %v3084_v40 }
 0x3d5   :  { %1143 = vmatpush.msrb.mxu1 %v2858_v17  ;;  %1163 = vmatpush.msrb.mxu0 %v3091_v10 }
 0x3d6   :  { %1104 = vmatpush.msra.mxu2 %v2865_v18  ;;  %1124 = vmatpush.msra.mxu3 %v3098_v35 }
 0x3d7   :  { %1144 = vmatpush.msrb.mxu1 %v2872_v19  ;;  %1164 = vmatpush.msrb.mxu0 %v3105_v52  ;;  %v3119_v19 = vld [vmem:[%s3311_s4 + $0x58] sm:$0xff] }
 0x3d8   :  { %1105 = vmatpush.msra.mxu2 %v2879_v20  ;;  %1125 = vmatpush.msra.mxu3 %v3112_v55  ;;  %3492 = vst [vmem:[#allocation8_spill] sm:$0xff] %v3119_v19  ;;  %v3126_v20 = vld [vmem:[%s3311_s4 + $0x28] sm:$0xff] }
 0x3d9   :  { %1145 = vmatpush.msrb.mxu1 %v2886_v22  ;;  %1165 = vmatpush.msrb.mxu0 %v3119_v19  ;;  %3493 = vst [vmem:[#allocation24_spill] sm:$0xff] %v3126_v20  ;;  %v3133_v22 = vld [vmem:[%s3311_s4 + $0x38] sm:$0xff] }
 0x3da   :  { %1106 = vmatpush.msra.mxu2 %v2893_v24  ;;  %1126 = vmatpush.msra.mxu3 %v3126_v20  ;;  %3494 = vst [vmem:[#allocation14_spill] sm:$0xff] %v3133_v22  ;;  %v3140_v24 = vld [vmem:[%s3311_s4 + $0x8] sm:$0xff] }
 0x3db   :  { %1146 = vmatpush.msrb.mxu1 %v2900_v25  ;;  %1166 = vmatpush.msrb.mxu0 %v3133_v22  ;;  %3495 = vst [vmem:[#allocation25_spill] sm:$0xff] %v3140_v24  ;;  %v3147_v25 = vld [vmem:[%s3311_s4 + $0x18] sm:$0xff]  ;;  %v870_v22 = vrot.slane %v3468_v38, 4 }
 0x3dc   :  { %1107 = vmatpush.msra.mxu2 %v2907_v26  ;;  %1127 = vmatpush.msra.mxu3 %v3140_v24  ;;  %3496 = vst [vmem:[#allocation9_spill] sm:$0xff] %v3147_v25  ;;  %v871_v26 = vrot.slane %v3483_v43, 4  ;;  %v872_v24 = vrot.slane %v3484_v48, 4 }
 0x3dd   :  { %1147 = vmatpush.msrb.mxu1 %v2914_v27  ;;  %1167 = vmatpush.msrb.mxu0 %v3147_v25  ;;  %v873_v27 = vrot.slane %v3485_v51, 4 }
 0x43a   :  { %v935_v35 = vpop.f32.mrf.mxu1  ;;  %v955_v18 = vpop.f32.mrf.mxu0 }
 0x43b   :  { %v936_v40 = vadd.f32 %v935_v35, %v872_v24  ;;  %v956_v15 = vadd.f32 %v955_v18, %v873_v27  ;;  %v3520_v27 = vld [vmem:[#allocation29_spill] sm:$0xff] }
 0x43d   :  { %v967_v38 = vmul.f32 0.5, %v956_v15 }
 0x43f   :  { %v895_v20 = vpop.f32.mrf.mxu2  ;;  %v915_v19 = vpop.f32.mrf.mxu3 }
 0x440   :  { %v896_v55 = vadd.f32 %v895_v20, %v870_v22  ;;  %v916_v52 = vadd.f32 %v915_v19, %v871_v26 }
 0x442   :  { %v958_v10 = vmul.f32 0.5, %v896_v55  ;;  %v962_v17 = vmul.f32 0.5, %v916_v52 }
 0x444   :  { %1449 = vtanh.f32 %v958_v10 }
 0x445   :  { %1451 = vtanh.f32 %v962_v17 }
 0x446   :  { %1453 = vtanh.f32 %v936_v40 }
 0x447   :  { %1455 = vtanh.f32 %v967_v38  ;;  %v3506_v38 = vld [vmem:[#allocation13_spill] sm:$0xff] }
 0x44a   :  { %v1450_v25 = vpop.eup %1449 }
 0x44b   :  { %v1452_v43 = vpop.eup %1451  ;;  %v960_v50 = vadd.f32 1.0, %v1450_v25 }
 0x44c   :  { %v964_v20 = vadd.f32 1.0, %v1452_v43  ;;  %v1454_v22 = vpop.eup %1453  ;;  %v978_v43 = vrot.slane %v3520_v27, 5 }
 0x44d   :  { %v961_v19 = vmul.f32 0.5, %v960_v50  ;;  %v1456_v51 = vpop.eup %1455 }
 0x44e   :  { %v965_v26 = vmul.f32 0.5, %v964_v20  ;;  %v969_v18 = vadd.f32 1.0, %v1456_v51 }
 0x44f   :  { %v972_v14 = vmul.f32 %v1454_v22, %v961_v19  ;;  %v1085_v22 = vrot.slane %v3520_v27, 6 }
 0x450   :  { %v971_v48 = vmul.f32 %v965_v26, %v2923_v61  ;;  %v970_v17 = vmul.f32 0.5, %v969_v18 }
 0x452   :  { %v3155_v55 = vadd.f32 %v972_v14, %v971_v48  ;;  %v3519_v14 = vld [vmem:[#allocation28_spill] sm:$0xff] }
 0x453   :  { %v977_v25 = vrot.slane %v3519_v14, 5  ;;  %v1084_v19 = vrot.slane %v3519_v14, 6 }
 0x454   :  { %1457 = vtanh.f32 %v3155_v55 }
 0x45a   :  { %v1458_v24 = vpop.eup %1457 }
 0x45b   :  { %v975_v15 = vmul.f32 %v1458_v24, %v970_v17 }
 0x45d   :  { %976 = vst [vmem:[#allocation2 + $0x4] sm:$0x1] %v975_v15  ;;  %1001 = vmatmul.f32.vlgmr.msrb.gmra.mxu2 %v975_v15  ;;  %1021 = vmatmul.f32.vlgmr.msrb.gmra.mxu3 %v975_v15 }
 0x45e   :  { %1041 = vmatmul.f32.vlgmr.msra.gmra.mxu1 %v975_v15  ;;  %1061 = vmatmul.f32.vlgmr.msra.gmra.mxu0 %v975_v15 }
 0x45f   :  { %1199 = vmatpush.msrb.mxu2 %v2625_v2  ;;  %1219 = vmatpush.msrb.mxu3 %v2930_v36  ;;  %v3497_v2 = vld [vmem:[#allocation3_spill] sm:$0xff] }
 0x460   :  { %1239 = vmatpush.msra.mxu1 %v2744_v54  ;;  %1259 = vmatpush.msra.mxu0 %v2937_v16  ;;  %v3507_v54 = vld [vmem:[#allocation5_spill] sm:$0xff] }
 0x461   :  { %1200 = vmatpush.msrb.mxu2 %v2634_v28  ;;  %1220 = vmatpush.msrb.mxu3 %v2944_v46  ;;  %v3498_v28 = vld [vmem:[#allocation12_spill] sm:$0xff] }
 0x462   :  { %1240 = vmatpush.msra.mxu1 %v2753_v56  ;;  %1260 = vmatpush.msra.mxu0 %v2951_v37  ;;  %v3508_v56 = vld [vmem:[#allocation23_spill] sm:$0xff]  ;;  %v3521_v37 = vld [vmem:[#allocation30_spill] sm:$0xff] }
 0x463   :  { %1201 = vmatpush.msrb.mxu2 %v2643_v29  ;;  %1221 = vmatpush.msrb.mxu3 %v2958_v21  ;;  %v3499_v29 = vld [vmem:[#allocation4_spill] sm:$0xff]  ;;  %v979_v21 = vrot.slane %v3521_v37, 5 }
 0x464   :  { %1241 = vmatpush.msra.mxu1 %v2762_v57  ;;  %1261 = vmatpush.msra.mxu0 %v2965_v31  ;;  %v3509_v57 = vld [vmem:[#allocation18_spill] sm:$0xff]  ;;  %v3522_v31 = vld [vmem:[#allocation31_spill] sm:$0xff] }
 0x465   :  { %1202 = vmatpush.msrb.mxu2 %v2652_v58  ;;  %1222 = vmatpush.msrb.mxu3 %v2972_v41  ;;  %v3500_v58 = vld [vmem:[#allocation21_spill] sm:$0xff]  ;;  %v980_v41 = vrot.slane %v3522_v31, 5 }
 0x466   :  { %1242 = vmatpush.msra.mxu1 %v2771_v60  ;;  %1262 = vmatpush.msra.mxu0 %v2979_v53  ;;  %v3510_v60 = vld [vmem:[#allocation8_spill] sm:$0xff] }
 0x467   :  { %1203 = vmatpush.msrb.mxu2 %v2661_v62  ;;  %1223 = vmatpush.msrb.mxu3 %v2986_v47  ;;  %v3501_v62 = vld [vmem:[#allocation16_spill] sm:$0xff] }
 0x468   :  { %1243 = vmatpush.msra.mxu1 %v2780_v63  ;;  %1263 = vmatpush.msra.mxu0 %v2993_v6  ;;  %v3511_v63 = vld [vmem:[#allocation11_spill] sm:$0xff] }
 0x469   :  { %1204 = vmatpush.msrb.mxu2 %v2670_v1  ;;  %1224 = vmatpush.msrb.mxu3 %v3000_v42  ;;  %v3502_v1 = vld [vmem:[#allocation7_spill] sm:$0xff] }
 0x46a   :  { %1244 = vmatpush.msra.mxu1 %v2789_v0  ;;  %1264 = vmatpush.msra.mxu0 %v3007_v49  ;;  %v3512_v0 = vld [vmem:[#allocation24_spill] sm:$0xff] }
 0x46b   :  { %1205 = vmatpush.msrb.mxu2 %v2679_v5  ;;  %1225 = vmatpush.msrb.mxu3 %v3014_v59  ;;  %v3503_v5 = vld [vmem:[#allocation10_spill] sm:$0xff] }
 0x46c   :  { %1245 = vmatpush.msra.mxu1 %v2798_v3  ;;  %1265 = vmatpush.msra.mxu0 %v3021_v33  ;;  %v3513_v3 = vld [vmem:[#allocation19_spill] sm:$0xff] }
 0x46d   :  { %1206 = vmatpush.msrb.mxu2 %v2688_v9  ;;  %1226 = vmatpush.msrb.mxu3 %v3028_v23  ;;  %v3504_v9 = vld [vmem:[#allocation22_spill] sm:$0xff] }
 0x46e   :  { %1246 = vmatpush.msra.mxu1 %v2807_v4  ;;  %1266 = vmatpush.msra.mxu0 %v3035_v39  ;;  %v3514_v4 = vld [vmem:[#allocation14_spill] sm:$0xff] }
 0x46f   :  { %1207 = vmatpush.msrb.mxu2 %v2697_v13  ;;  %1227 = vmatpush.msrb.mxu3 %v3042_v44  ;;  %v3505_v13 = vld [vmem:[#allocation17_spill] sm:$0xff] }
 0x470   :  { %1247 = vmatpush.msra.mxu1 %v2816_v7  ;;  %1267 = vmatpush.msra.mxu0 %v3049_v45  ;;  %v3515_v7 = vld [vmem:[#allocation6_spill] sm:$0xff] }
 0x471   :  { %1208 = vmatpush.msrb.mxu2 %v2823_v8  ;;  %1228 = vmatpush.msrb.mxu3 %v3056_v30  ;;  %v3516_v8 = vld [vmem:[#allocation25_spill] sm:$0xff] }
 0x472   :  { %1248 = vmatpush.msra.mxu1 %v2830_v11  ;;  %1268 = vmatpush.msra.mxu0 %v3063_v32  ;;  %v3517_v11 = vld [vmem:[#allocation20_spill] sm:$0xff] }
 0x473   :  { %1209 = vmatpush.msrb.mxu2 %v2837_v12  ;;  %1229 = vmatpush.msrb.mxu3 %v3070_v34  ;;  %v3518_v12 = vld [vmem:[#allocation9_spill] sm:$0xff] }
 0x474   :  { %1249 = vmatpush.msra.mxu1 %v3497_v2  ;;  %1269 = vmatpush.msra.mxu0 %v3498_v28  ;;  %v1086_v2 = vrot.slane %v3521_v37, 6  ;;  %v1087_v28 = vrot.slane %v3522_v31, 6 }
 0x475   :  { %1210 = vmatpush.msrb.mxu2 %v3499_v29  ;;  %1230 = vmatpush.msrb.mxu3 %v3500_v58 }
 0x476   :  { %1250 = vmatpush.msra.mxu1 %v3501_v62  ;;  %1270 = vmatpush.msra.mxu0 %v3502_v1 }
 0x477   :  { %1211 = vmatpush.msrb.mxu2 %v3503_v5  ;;  %1231 = vmatpush.msrb.mxu3 %v3504_v9 }
 0x478   :  { %1251 = vmatpush.msra.mxu1 %v3505_v13  ;;  %1271 = vmatpush.msra.mxu0 %v3506_v38 }
 0x479   :  { %1212 = vmatpush.msrb.mxu2 %v3507_v54  ;;  %1232 = vmatpush.msrb.mxu3 %v3508_v56 }
 0x47a   :  { %1252 = vmatpush.msra.mxu1 %v3509_v57  ;;  %1272 = vmatpush.msra.mxu0 %v3510_v60 }
 0x47b   :  { %1213 = vmatpush.msrb.mxu2 %v3511_v63  ;;  %1233 = vmatpush.msrb.mxu3 %v3512_v0 }
 0x47c   :  { %1253 = vmatpush.msra.mxu1 %v3513_v3  ;;  %1273 = vmatpush.msra.mxu0 %v3514_v4 }
 0x47d   :  { %1214 = vmatpush.msrb.mxu2 %v3515_v7  ;;  %1234 = vmatpush.msrb.mxu3 %v3516_v8 }
 0x47e   :  { %1254 = vmatpush.msra.mxu1 %v3517_v11  ;;  %1274 = vmatpush.msra.mxu0 %v3518_v12 }
 0x4db   :  { %v1042_v16 = vpop.f32.mrf.mxu1  ;;  %v1062_v46 = vpop.f32.mrf.mxu0 }
 0x4dc   :  { %v1043_v6 = vadd.f32 %v1042_v16, %v979_v21  ;;  %v1063_v42 = vadd.f32 %v1062_v46, %v980_v41  ;;  %v1309_v16 = vld [vmem:[%s3310_s5 + $0x48] sm:$0xff]  ;;  %v1308_v46 = vld [vmem:[%s3310_s5 + $0x40] sm:$0xff]  ;;  %v1307_v21 = vld [vmem:[%s3310_s5 + $0x38] sm:$0xff] }
 0x4dd   :  { %v1306_v41 = vld [vmem:[%s3310_s5 + $0x30] sm:$0xff] }
 0x4de   :  { %v1074_v49 = vmul.f32 0.5, %v1063_v42 }
 0x4e0   :  { %v1002_v48 = vpop.f32.mrf.mxu2  ;;  %v1022_v51 = vpop.f32.mrf.mxu3 }
 0x4e1   :  { %v1003_v61 = vadd.f32 %v1002_v48, %v977_v25  ;;  %v1023_v36 = vadd.f32 %v1022_v51, %v978_v43  ;;  %v1315_v25 = vld [vmem:[%s3310_s5 + $0x78] sm:$0xff]  ;;  %v1314_v43 = vld [vmem:[%s3310_s5 + $0x70] sm:$0xff]  ;;  %v1313_v48 = vld [vmem:[%s3310_s5 + $0x68] sm:$0xff] }
 0x4e2   :  { %v1312_v51 = vld [vmem:[%s3310_s5 + $0x60] sm:$0xff] }
 0x4e3   :  { %v1065_v53 = vmul.f32 0.5, %v1003_v61  ;;  %v1069_v47 = vmul.f32 0.5, %v1023_v36  ;;  %v1311_v61 = vld [vmem:[%s3310_s5 + $0x58] sm:$0xff]  ;;  %v1310_v36 = vld [vmem:[%s3310_s5 + $0x50] sm:$0xff] }
 0x4e5   :  { %1459 = vtanh.f32 %v1065_v53  ;;  %v1191_v53 = vrot.slane %v3519_v14, 7  ;;  %v1193_v14 = vrot.slane %v3521_v37, 7  ;;  %v1301_v37 = vld [vmem:[%s3310_s5 + $0x8] sm:$0xff] }
 0x4e6   :  { %1461 = vtanh.f32 %v1069_v47  ;;  %v1192_v47 = vrot.slane %v3520_v27, 7  ;;  %v1194_v27 = vrot.slane %v3522_v31, 7 }
 0x4e7   :  { %1463 = vtanh.f32 %v1043_v6  ;;  %v1305_v6 = vld [vmem:[%s3310_s5 + $0x28] sm:$0xff] }
 0x4e8   :  { %1465 = vtanh.f32 %v1074_v49 }
 0x4eb   :  { %v1460_v59 = vpop.eup %1459 }
 0x4ec   :  { %v1462_v33 = vpop.eup %1461  ;;  %v1067_v23 = vadd.f32 1.0, %v1460_v59 }
 0x4ed   :  { %v1071_v39 = vadd.f32 1.0, %v1462_v33  ;;  %v1464_v45 = vpop.eup %1463 }
 0x4ee   :  { %v1068_v44 = vmul.f32 0.5, %v1067_v23  ;;  %v1466_v50 = vpop.eup %1465  ;;  %v1304_v23 = vld [vmem:[%s3310_s5 + $0x20] sm:$0xff] }
 0x4ef   :  { %v1072_v30 = vmul.f32 0.5, %v1071_v39  ;;  %v1076_v10 = vadd.f32 1.0, %v1466_v50 }
 0x4f0   :  { %v1079_v32 = vmul.f32 %v1464_v45, %v1068_v44 }
 0x4f1   :  { %v1078_v34 = vmul.f32 %v1072_v30, %v3155_v55  ;;  %v1077_v35 = vmul.f32 0.5, %v1076_v10  ;;  %v1300_v10 = vld [vmem:[%s3310_s5] sm:$0xff] }
 0x4f3   :  { %v1080_v40 = vadd.f32 %v1079_v32, %v1078_v34  ;;  %v1303_v32 = vld [vmem:[%s3310_s5 + $0x18] sm:$0xff] }
 0x4f5   :  { %1467 = vtanh.f32 %v1080_v40 }
 0x4fb   :  { %v1468_v52 = vpop.eup %1467 }
 0x4fc   :  { %v1082_v20 = vmul.f32 %v1468_v52, %v1077_v35 }
 0x4fe   :  { %1083 = vst [vmem:[#allocation2 + $0x5] sm:$0x1] %v1082_v20  ;;  %1108 = vmatmul.f32.vlgmr.msra.gmra.mxu2 %v1082_v20  ;;  %1128 = vmatmul.f32.vlgmr.msra.gmra.mxu3 %v1082_v20 }
 0x4ff   :  { %1148 = vmatmul.f32.vlgmr.msrb.gmra.mxu1 %v1082_v20  ;;  %1168 = vmatmul.f32.vlgmr.msrb.gmra.mxu0 %v1082_v20 }
 0x500   :  { %1316 = vmatpush.msra.mxu2 %v1315_v25 }
 0x502   :  { %1317 = vmatpush.msra.mxu2 %v1314_v43 }
 0x504   :  { %1318 = vmatpush.msra.mxu2 %v1313_v48 }
 0x506   :  { %1319 = vmatpush.msra.mxu2 %v1312_v51 }
 0x508   :  { %1320 = vmatpush.msra.mxu2 %v1311_v61 }
 0x50a   :  { %1321 = vmatpush.msra.mxu2 %v1310_v36 }
 0x50c   :  { %1322 = vmatpush.msra.mxu2 %v1309_v16 }
 0x50e   :  { %1323 = vmatpush.msra.mxu2 %v1308_v46 }
 0x510   :  { %1324 = vmatpush.msra.mxu2 %v1307_v21 }
 0x512   :  { %1325 = vmatpush.msra.mxu2 %v1306_v41 }
 0x514   :  { %1326 = vmatpush.msra.mxu2 %v1305_v6 }
 0x516   :  { %1327 = vmatpush.msra.mxu2 %v1304_v23 }
 0x518   :  { %1328 = vmatpush.msra.mxu2 %v1303_v32 }
 0x57c   :  { %v1149_v24 = vpop.f32.mrf.mxu1  ;;  %v1169_v15 = vpop.f32.mrf.mxu0 }
 0x57d   :  { %v1150_v62 = vadd.f32 %v1149_v24, %v1086_v2  ;;  %v1170_v1 = vadd.f32 %v1169_v15, %v1087_v28 }
 0x57f   :  { %v1181_v5 = vmul.f32 0.5, %v1170_v1 }
 0x581   :  { %v1109_v26 = vpop.f32.mrf.mxu2  ;;  %v1129_v18 = vpop.f32.mrf.mxu3 }
 0x582   :  { %v1110_v17 = vadd.f32 %v1109_v26, %v1084_v19  ;;  %v1130_v55 = vadd.f32 %v1129_v18, %v1085_v22 }
 0x584   :  { %v1172_v29 = vmul.f32 0.5, %v1110_v17  ;;  %v1176_v58 = vmul.f32 0.5, %v1130_v55 }
 0x586   :  { %1469 = vtanh.f32 %v1172_v29 }
 0x587   :  { %1471 = vtanh.f32 %v1176_v58 }
 0x588   :  { %1473 = vtanh.f32 %v1150_v62 }
 0x589   :  { %1475 = vtanh.f32 %v1181_v5 }
 0x58c   :  { %v1470_v9 = vpop.eup %1469 }
 0x58d   :  { %v1472_v13 = vpop.eup %1471  ;;  %v1174_v38 = vadd.f32 1.0, %v1470_v9  ;;  %v1342_v9 = vld [vmem:[%s3310_s5 + $0x90] sm:$0xff] }
 0x58e   :  { %v1178_v54 = vadd.f32 1.0, %v1472_v13  ;;  %v1474_v57 = vpop.eup %1473  ;;  %v1343_v13 = vld [vmem:[%s3310_s5 + $0x98] sm:$0xff] }
 0x58f   :  { %v1175_v56 = vmul.f32 0.5, %v1174_v38  ;;  %v1476_v3 = vpop.eup %1475  ;;  %v1561_v38 = vmov 0  }
 0x590   :  { %v1179_v60 = vmul.f32 0.5, %v1178_v54  ;;  %v1183_v7 = vadd.f32 1.0, %v1476_v3  ;;  %1405 = vset.pattern.permute.xlu0 %v1561_v38  ;;  %1406 = vset.pattern.permute.xlu1 %v1561_v38 }
 0x591   :  { %v1186_v63 = vmul.f32 %v1474_v57, %v1175_v56  ;;  %1351 = vperm.xlu1 %1406, %v1343_v13   ;;  %v1340_v56 = vld [vmem:[%s3310_s5 + $0x80] sm:$0xff]  ;;  %v1341_v57 = vld [vmem:[%s3310_s5 + $0x88] sm:$0xff] }
 0x592   :  { %v1185_v0 = vmul.f32 %v1179_v60, %v1080_v40  ;;  %v1184_v8 = vmul.f32 0.5, %v1183_v7  ;;  %v1302_v40 = vld [vmem:[%s3310_s5 + $0x10] sm:$0xff] }
 0x593   :  { %1329 = vmatpush.msra.mxu2 %v1302_v40 }
 0x594   :  { %v3231_v4 = vadd.f32 %v1186_v63, %v1185_v0 }
 0x595   :  { %1330 = vmatpush.msra.mxu2 %v1301_v37 }
 0x596   :  { %1477 = vtanh.f32 %v3231_v4 }
 0x597   :  { %1331 = vmatpush.msra.mxu2 %v1300_v10 }
 0x59c   :  { %v1478_v11 = vpop.eup %1477 }
 0x59d   :  { %v1189_v12 = vmul.f32 %v1478_v11, %v1184_v8 }
 0x59f   :  { %1190 = vst [vmem:[#allocation2 + $0x6] sm:$0x1] %v1189_v12  ;;  %1215 = vmatmul.f32.vlgmr.msrb.gmra.mxu2 %v1189_v12  ;;  %1235 = vmatmul.f32.vlgmr.msrb.gmra.mxu3 %v1189_v12 }
 0x5a0   :  { %1255 = vmatmul.f32.vlgmr.msra.gmra.mxu1 %v1189_v12  ;;  %1275 = vmatmul.f32.vlgmr.msra.gmra.mxu0 %v1189_v12 }
 0x61d   :  { %v1256_v39 = vpop.f32.mrf.mxu1  ;;  %v1276_v44 = vpop.f32.mrf.mxu0 }
 0x61e   :  { %v1257_v34 = vadd.f32 %v1256_v39, %v1193_v14  ;;  %v1277_v50 = vadd.f32 %v1276_v44, %v1194_v27 }
 0x620   :  { %v1288_v31 = vmul.f32 0.5, %v1277_v50 }
 0x622   :  { %v1216_v42 = vpop.f32.mrf.mxu2  ;;  %v1236_v49 = vpop.f32.mrf.mxu3 }
 0x623   :  { %v1217_v59 = vadd.f32 %v1216_v42, %v1191_v53  ;;  %v1237_v33 = vadd.f32 %v1236_v49, %v1192_v47 }
 0x625   :  { %v1279_v45 = vmul.f32 0.5, %v1217_v59  ;;  %v1283_v30 = vmul.f32 0.5, %v1237_v33 }
 0x627   :  { %1479 = vtanh.f32 %v1279_v45 }
 0x628   :  { %1481 = vtanh.f32 %v1283_v30 }
 0x629   :  { %1483 = vtanh.f32 %v1257_v34 }
 0x62a   :  { %1485 = vtanh.f32 %v1288_v31 }
 0x62d   :  { %v1480_v35 = vpop.eup %1479 }
 0x62e   :  { %v1482_v52 = vpop.eup %1481  ;;  %v1281_v20 = vadd.f32 1.0, %v1480_v35 }
 0x62f   :  { %v1285_v19 = vadd.f32 1.0, %v1482_v52  ;;  %v1484_v26 = vpop.eup %1483 }
 0x630   :  { %v1282_v22 = vmul.f32 0.5, %v1281_v20  ;;  %v1486_v24 = vpop.eup %1485 }
 0x631   :  { %v1286_v18 = vmul.f32 0.5, %v1285_v19  ;;  %v1290_v2 = vadd.f32 1.0, %v1486_v24 }
 0x632   :  { %v1293_v17 = vmul.f32 %v1484_v26, %v1282_v22 }
 0x633   :  { %v1292_v55 = vmul.f32 %v1286_v18, %v3231_v4  ;;  %v1291_v28 = vmul.f32 0.5, %v1290_v2  ;;  %v1352_v4 = vpop.permute.xlu1 %1351 }
 0x635   :  { %v1294_v15 = vadd.f32 %v1293_v17, %v1292_v55 }
 0x637   :  { %1487 = vtanh.f32 %v1294_v15 }
 0x63d   :  { %v1488_v29 = vpop.eup %1487 }
 0x63e   :  { %v1296_v58 = vmul.f32 %v1488_v29, %v1291_v28 }
 0x640   :  { %1297 = vst [vmem:[#allocation2 + $0x7] sm:$0x1] %v1296_v58 }
 0x647   :  { %v1298_v62 = vld [vmem:[#allocation2] sm:$0xff] }
 0x648   :  { %1489 = vtanh.f32 %v1298_v62 }
 0x64e   :  { %v1490_v1 = vpop.eup %1489 }
 0x64f   :  { %1332 = vmatmul.f32.vlgmr.msra.gmra.mxu2 %v1490_v1 }
 0x6d2   :  { %v1333_v5 = vpop.f32.mrf.mxu2 }
 0x6d3   :  { %1337 = vrot.lane.b32.xlu0 %v1333_v5, %s1560_s24 }
 0x6db   :  { %1346 = vperm.xlu0 %1405, %v1342_v9  }
 0x745   :  { %v1338_v54 = vpop.permute.xlu0 %1337 }
 0x746   :  { %1375 = vmatpush.msra.mxu3 %v1338_v54 }
 0x748   :  { %1376 = vmatpush.msra.mxu3 %v1333_v5 }
 0x749   :  { %1400 = vmatmul.msk.f32.vlgmr.msra.gmra.mxu3 %vm1354_vm2, %v1340_v56 }
 0x74d   :  { %v1347_v60 = vpop.permute.xlu0 %1346 }
 0x751   :  { %1401 = vmatmul.msk.f32.gmra.mxu3 %vm1354_vm2, %v1341_v57 }
 0x7cc   :  { %v1378_v63 = vpop.f32.mrf.mxu3 }
 0x7cd   :  { %v1379_v0 = vadd.f32 %v1378_v63, %v1347_v60 }
 0x7cf   :  { %v1384_v3 = vmul.f32 0.5, %v1379_v0 }
 0x7d1   :  { %1491 = vtanh.f32 %v1384_v3 }
 0x7d4   :  { %v1381_v7 = vpop.f32.mrf.mxu3 }
 0x7d5   :  { %v1382_v8 = vadd.f32 %v1381_v7, %v1352_v4 }
 0x7d7   :  { %v1492_v11 = vpop.eup %1491  ;;  %v1385_v12 = vmul.f32 0.5, %v1382_v8 }
 0x7d8   :  { %v1388_v25 = vadd.f32 1.0, %v1492_v11 }
 0x7d9   :  { %1493 = vtanh.f32 %v1385_v12 }
 0x7da   :  { %v1390_v43 = vmul.f32 0.5, %v1388_v25 }
 0x7dc   :  { %1392 = vst.msk [vmem:[%s3313_s6] sm:$0xff] %vm60_vm1, %v1390_v43 }
 0x7df   :  { %v1494_v48 = vpop.eup %1493 }
 0x7e0   :  { %v1389_v51 = vadd.f32 1.0, %v1494_v48 }
 0x7e2   :  { %v1391_v61 = vmul.f32 0.5, %v1389_v51 }
 0x7e4   :  { %1393 = vst.msk [vmem:[%s3313_s6 + $0x8] sm:$0xff] %vm60_vm1, %v1391_v61 }

</bundles_post_ra>
